<compile_context>
chip_gen: v7x
topology: tpu7x:2x2x1
jax: 0.10.0
libtpu: 0.0.40
codegen_flags: <defaults>
</compile_context>

<pallas_src>
import functools

import jax
import jax.numpy as jnp
from jax import lax
from jax.experimental import pallas as pl
from jax.experimental.pallas import tpu as pltpu


def _mlp_kernel(x_ref, w1_ref, b1_ref, w2_ref, b2_ref, w3_ref, b3_ref, o_ref):
    # Whole hot path (3 matmuls + 2 ReLUs + bias adds) fused in one kernel.
    x = x_ref[...]
    h1 = jnp.dot(x, w1_ref[...], preferred_element_type=jnp.float32,
                 precision=lax.Precision.HIGHEST) + b1_ref[...]
    h1 = jnp.maximum(h1, 0.0)
    h2 = jnp.dot(h1, w2_ref[...], preferred_element_type=jnp.float32,
                 precision=lax.Precision.HIGHEST) + b2_ref[...]
    h2 = jnp.maximum(h2, 0.0)
    o = jnp.dot(h2, w3_ref[...], preferred_element_type=jnp.float32,
                precision=lax.Precision.HIGHEST) + b3_ref[...]
    o_ref[...] = o.astype(o_ref.dtype)


def _round_up(n, m):
    return (n + m - 1) // m * m


def _pick_block_b(B):
    # Small batch: one grid step (pure fixed-overhead regime, no partial tiles).
    if B < 256:
        return B
    # Guarantee >= 2 grid steps so dimension_semantics=("parallel",) can shard
    # the batch axis across v7x's two TensorCores; cap the tile at 2048 rows so
    # each step carries plenty of MXU work while VMEM stays ~a few MiB.
    half = _round_up((B + 1) // 2, 8)
    return max(8, min(2048, half))


@functools.partial(jax.jit, static_argnames=("block_b",))
def nn_linear_v1_forward(x, params, block_b=None):
    """x: (B, nsipms) float32. params: prepared dict (see init_params)."""
    w1, b1 = params["w1"], params["b1"]
    w2, b2 = params["w2"], params["b2"]
    w3, b3 = params["w3"], params["b3"]

    B, nsipms = x.shape
    h1 = w1.shape[1]          # 512
    h2 = w2.shape[1]          # 64
    nout2 = w3.shape[1]       # nout * 2

    # ---- batch tile selection ----
    if block_b is None:
        block_b = _pick_block_b(B)
    block_b = max(1, min(int(block_b), B))
    if block_b != B:
        # second-to-last block dim must be a multiple of 8 (or equal full dim)
        block_b = _round_up(block_b, 8)

    grid = (pl.cdiv(B, block_b),)

    # ---- explicit VMEM budget (actual footprint is small; cap at 32 MiB) ----
    f32 = 4
    weight_bytes = (nsipms * h1 + h1 + h1 * h2 + h2 + h2 * nout2 + nout2) * f32
    stream_bytes = 2 * block_b * (nsipms + nout2) * f32      # double-buffered x/out
    interm_bytes = block_b * (h1 + h2 + nout2) * f32         # h1, h2, o live values
    vmem_limit = int(min(
        max(2 * (weight_bytes + stream_bytes + interm_bytes) + (4 << 20), 16 << 20),
        32 << 20))

    out = pl.pallas_call(
        _mlp_kernel,
        out_shape=jax.ShapeDtypeStruct((B, nout2), jnp.float32),
        grid_spec=pltpu.PrefetchScalarGridSpec(
            num_scalar_prefetch=0,
            grid=grid,
            in_specs=[
                # x: tiled over batch (streams HBM->VMEM, double-buffered)
                pl.BlockSpec((block_b, nsipms), lambda i: (i, 0)),
                # weights/biases: full arrays, constant index_map -> resident
                pl.BlockSpec((nsipms, h1), lambda i: (0, 0)),
                pl.BlockSpec((1, h1), lambda i: (0, 0)),
                pl.BlockSpec((h1, h2), lambda i: (0, 0)),
                pl.BlockSpec((1, h2), lambda i: (0, 0)),
                pl.BlockSpec((h2, nout2), lambda i: (0, 0)),
                pl.BlockSpec((1, nout2), lambda i: (0, 0)),
            ],
            # Output at natural width: block last dim == full array dim, so no
            # lane padding and no post-kernel slice.
            out_specs=pl.BlockSpec((block_b, nout2), lambda i: (i, 0)),
        ),
        compiler_params=pltpu.CompilerParams(
            dimension_semantics=("parallel",),
            vmem_limit_bytes=vmem_limit,
        ),
    )(x.astype(jnp.float32), w1, b1, w2, b2, w3, b3)

    return out


def prepare_params(raw):
    """One-time prep: cast to f32 and reshape biases to (1, N) for in-kernel
    broadcast. Keep this OUTSIDE the per-call forward."""
    out = {}
    for k, v in raw.items():
        v = jnp.asarray(v, dtype=jnp.float32)
        if k.startswith("b"):
            v = v.reshape(1, -1)
        out[k] = v
    return out


def init_params(key, nsipms, nout):
    """Deterministic init mimicking torch.nn.Linear default U(-1/sqrt(fan_in), +),
    already in prepared ((in,out) f32 weights, (1,out) f32 biases) layout."""
    dims = [(nsipms, 512), (512, 64), (64, nout * 2)]
    raw = {}
    for idx, (fan_in, fan_out) in enumerate(dims, start=1):
        key, kw, kb = jax.random.split(key, 3)
        bound = 1.0 / (fan_in ** 0.5)
        raw[f"w{idx}"] = jax.random.uniform(
            kw, (fan_in, fan_out), minval=-bound, maxval=bound, dtype=jnp.float32)
        raw[f"b{idx}"] = jax.random.uniform(
            kb, (fan_out,), minval=-bound, maxval=bound, dtype=jnp.float32)
    return prepare_params(raw)


def _reference_forward(x, params):
    h1 = jnp.maximum(x @ params["w1"] + params["b1"], 0.0)
    h2 = jnp.maximum(h1 @ params["w2"] + params["b2"], 0.0)
    return h2 @ params["w3"] + params["b3"]


if __name__ == "__main__":
    nsipms = 32   # input feature count (constructor arg)
    nout = 3      # -> output dim = nout * 2 = 6

    key = jax.random.PRNGKey(0)
    kx, kp, kx2, kx3 = jax.random.split(key, 4)
    params = init_params(kp, nsipms, nout)

    # Small-batch path: single grid step (block_b = B).
    batch = 8
    x = jax.random.normal(kx, (batch, nsipms), dtype=jnp.float32)
    out = jax.block_until_ready(nn_linear_v1_forward(x, params))
    ref = _reference_forward(x, params)
    assert out.shape == (batch, nout * 2), out.shape
    assert jnp.allclose(out, ref, atol=1e-4, rtol=1e-4), "mismatch vs JAX reference (B=8)"

    # Mid-size batch: automatic >=2-step split (two-TensorCore path on v7x),
    # with a partial trailing tile.
    batch2 = 300
    x2 = jax.random.normal(kx2, (batch2, nsipms), dtype=jnp.float32)
    out2 = jax.block_until_ready(nn_linear_v1_forward(x2, params))
    ref2 = _reference_forward(x2, params)
    assert out2.shape == (batch2, nout * 2), out2.shape
    assert jnp.allclose(out2, ref2, atol=1e-4, rtol=1e-4), "mismatch vs JAX reference (B=300)"

    # Explicit tile override: exercises partial tiles + grid pipelining.
    batch3 = 300
    x3 = jax.random.normal(kx3, (batch3, nsipms), dtype=jnp.float32)
    out3 = jax.block_until_ready(nn_linear_v1_forward(x3, params, block_b=128))
    ref3 = _reference_forward(x3, params)
    assert out3.shape == (batch3, nout * 2), out3.shape
    assert jnp.allclose(out3, ref3, atol=1e-4, rtol=1e-4), "mismatch vs JAX reference (block_b=128)"

    print("KERNEL_OK")
</pallas_src>

<mosaic_0001>
module attributes {stable_mosaic.version = 11 : i64} {
  func.func @_mlp_kernel(%arg0: i32, %arg1: memref<8x32xf32, #tpu.memory_space<vmem>>, %arg2: memref<32x512xf32, #tpu.memory_space<vmem>>, %arg3: memref<1x512xf32, #tpu.memory_space<vmem>>, %arg4: memref<512x64xf32, #tpu.memory_space<vmem>>, %arg5: memref<1x64xf32, #tpu.memory_space<vmem>>, %arg6: memref<64x6xf32, #tpu.memory_space<vmem>>, %arg7: memref<1x6xf32, #tpu.memory_space<vmem>>, %arg8: memref<8x6xf32, #tpu.memory_space<vmem>>) attributes {dimension_semantics = [#tpu.dimension_semantics<parallel>], iteration_bounds = array<i64: 1>, scalar_prefetch = 0 : i64, scratch_operands = 0 : i64, tpu.core_type = #tpu.core_type<tc>, window_params = [{transform_indices = @transform_0, window_bounds = array<i64: 8, 32>}, {pipeline_mode = #tpu.pipeline_mode<synchronous>, transform_indices = @transform_1, window_bounds = array<i64: 32, 512>}, {pipeline_mode = #tpu.pipeline_mode<synchronous>, transform_indices = @transform_2, window_bounds = array<i64: 1, 512>}, {pipeline_mode = #tpu.pipeline_mode<synchronous>, transform_indices = @transform_3, window_bounds = array<i64: 512, 64>}, {pipeline_mode = #tpu.pipeline_mode<synchronous>, transform_indices = @transform_4, window_bounds = array<i64: 1, 64>}, {pipeline_mode = #tpu.pipeline_mode<synchronous>, transform_indices = @transform_5, window_bounds = array<i64: 64, 6>}, {pipeline_mode = #tpu.pipeline_mode<synchronous>, transform_indices = @transform_6, window_bounds = array<i64: 1, 6>}, {transform_indices = @transform_7, window_bounds = array<i64: 8, 6>}]} {
    %c0 = arith.constant 0 : index
    %c0_0 = arith.constant 0 : index
    %0 = vector.load %arg1[%c0, %c0_0] : memref<8x32xf32, #tpu.memory_space<vmem>>, vector<8x32xf32>
    %c0_1 = arith.constant 0 : index
    %c0_2 = arith.constant 0 : index
    %1 = vector.load %arg2[%c0_1, %c0_2] : memref<32x512xf32, #tpu.memory_space<vmem>>, vector<32x512xf32>
    %cst = arith.constant dense<0.000000e+00> : vector<8x512xf32>
    %2 = tpu.matmul %0, %1, %cst {dimension_numbers = #tpu.dot_dimension_numbers<[1], [0], [0], [1], [0, 0, 1, 1], [], []>, precision = #tpu.contract_precision<fp32>} : vector<8x32xf32>, vector<32x512xf32>, vector<8x512xf32> -> vector<8x512xf32>
    %c0_3 = arith.constant 0 : index
    %c0_4 = arith.constant 0 : index
    %3 = vector.load %arg3[%c0_3, %c0_4] : memref<1x512xf32, #tpu.memory_space<vmem>>, vector<1x512xf32>
    %4 = vector.broadcast %3 : vector<1x512xf32> to vector<8x512xf32>
    %5 = arith.addf %2, %4 : vector<8x512xf32>
    %cst_5 = arith.constant 0.000000e+00 : f32
    %6 = vector.broadcast %cst_5 : f32 to vector<8x512xf32>
    %7 = arith.maximumf %5, %6 : vector<8x512xf32>
    %c0_6 = arith.constant 0 : index
    %c0_7 = arith.constant 0 : index
    %8 = vector.load %arg4[%c0_6, %c0_7] : memref<512x64xf32, #tpu.memory_space<vmem>>, vector<512x64xf32>
    %cst_8 = arith.constant dense<0.000000e+00> : vector<8x64xf32>
    %9 = tpu.matmul %7, %8, %cst_8 {dimension_numbers = #tpu.dot_dimension_numbers<[1], [0], [0], [1], [0, 0, 1, 1], [], []>, precision = #tpu.contract_precision<fp32>} : vector<8x512xf32>, vector<512x64xf32>, vector<8x64xf32> -> vector<8x64xf32>
    %c0_9 = arith.constant 0 : index
    %c0_10 = arith.constant 0 : index
    %10 = vector.load %arg5[%c0_9, %c0_10] : memref<1x64xf32, #tpu.memory_space<vmem>>, vector<1x64xf32>
    %11 = vector.broadcast %10 : vector<1x64xf32> to vector<8x64xf32>
    %12 = arith.addf %9, %11 : vector<8x64xf32>
    %cst_11 = arith.constant 0.000000e+00 : f32
    %13 = vector.broadcast %cst_11 : f32 to vector<8x64xf32>
    %14 = arith.maximumf %12, %13 : vector<8x64xf32>
    %c0_12 = arith.constant 0 : index
    %c0_13 = arith.constant 0 : index
    %15 = vector.load %arg6[%c0_12, %c0_13] : memref<64x6xf32, #tpu.memory_space<vmem>>, vector<64x6xf32>
    %cst_14 = arith.constant dense<0.000000e+00> : vector<8x6xf32>
    %16 = tpu.matmul %14, %15, %cst_14 {dimension_numbers = #tpu.dot_dimension_numbers<[1], [0], [0], [1], [0, 0, 1, 1], [], []>, precision = #tpu.contract_precision<fp32>} : vector<8x64xf32>, vector<64x6xf32>, vector<8x6xf32> -> vector<8x6xf32>
    %c0_15 = arith.constant 0 : index
    %c0_16 = arith.constant 0 : index
    %17 = vector.load %arg7[%c0_15, %c0_16] : memref<1x6xf32, #tpu.memory_space<vmem>>, vector<1x6xf32>
    %18 = vector.broadcast %17 : vector<1x6xf32> to vector<8x6xf32>
    %19 = arith.addf %16, %18 : vector<8x6xf32>
    %c0_17 = arith.constant 0 : index
    %c0_18 = arith.constant 0 : index
    %20 = vector.load %arg8[%c0_17, %c0_18] : memref<8x6xf32, #tpu.memory_space<vmem>>, vector<8x6xf32>
    tpu.vector_store %arg8[%c0_17, %c0_18], %19 {strides = array<i32>} : memref<8x6xf32, #tpu.memory_space<vmem>>, vector<8x6xf32>,
    return
  }
  func.func @transform_0(%arg0: i32) -> (i32, i32) {
    %c0_i32 = arith.constant 0 : i32
    %c0_i32_0 = arith.constant 0 : i32
    return %arg0, %c0_i32 : i32, i32
  }
  func.func @transform_1(%arg0: i32) -> (i32, i32) {
    %c0_i32 = arith.constant 0 : i32
    %c0_i32_0 = arith.constant 0 : i32
    %c0_i32_1 = arith.constant 0 : i32
    return %c0_i32, %c0_i32_0 : i32, i32
  }
  func.func @transform_2(%arg0: i32) -> (i32, i32) {
    %c0_i32 = arith.constant 0 : i32
    %c0_i32_0 = arith.constant 0 : i32
    %c0_i32_1 = arith.constant 0 : i32
    return %c0_i32, %c0_i32_0 : i32, i32
  }
  func.func @transform_3(%arg0: i32) -> (i32, i32) {
    %c0_i32 = arith.constant 0 : i32
    %c0_i32_0 = arith.constant 0 : i32
    %c0_i32_1 = arith.constant 0 : i32
    return %c0_i32, %c0_i32_0 : i32, i32
  }
  func.func @transform_4(%arg0: i32) -> (i32, i32) {
    %c0_i32 = arith.constant 0 : i32
    %c0_i32_0 = arith.constant 0 : i32
    %c0_i32_1 = arith.constant 0 : i32
    return %c0_i32, %c0_i32_0 : i32, i32
  }
  func.func @transform_5(%arg0: i32) -> (i32, i32) {
    %c0_i32 = arith.constant 0 : i32
    %c0_i32_0 = arith.constant 0 : i32
    %c0_i32_1 = arith.constant 0 : i32
    return %c0_i32, %c0_i32_0 : i32, i32
  }
  func.func @transform_6(%arg0: i32) -> (i32, i32) {
    %c0_i32 = arith.constant 0 : i32
    %c0_i32_0 = arith.constant 0 : i32
    %c0_i32_1 = arith.constant 0 : i32
    return %c0_i32, %c0_i32_0 : i32, i32
  }
  func.func @transform_7(%arg0: i32) -> (i32, i32) {
    %c0_i32 = arith.constant 0 : i32
    %c0_i32_0 = arith.constant 0 : i32
    return %arg0, %c0_i32 : i32, i32
  }
}

</mosaic_0001>

<bundles_post_ra>
// kernel: nn_linear_v1_forward.1
= control target key start
LH: loop header
LB: loop body
LE: loop exit
PB: predicated region body
PF: predicated region fallthrough
CT: control target
= control target key end

     0   :  { %vm66_vm0 = vcmask 261120   ;;  %v6418_v9 = vmov 0.0   ;;  %s6399_s0 = inlined_call_operand.vmem [shape: f32[8,32], index: 0, kind: input, shape index: {}]   ;;  %s6400_s1 = inlined_call_operand.vmem [shape: f32[32,512], index: 1, kind: input, shape index: {}]   ;;  %s6401_s2 = inlined_call_operand.vmem [shape: f32[1,512], index: 2, kind: input, shape index: {}]   ;;  %s6402_s3 = inlined_call_operand.vmem [shape: f32[512,64], index: 3, kind: input, shape index: {}]   ;;  %s6403_s4 = inlined_call_operand.vmem [shape: f32[1,64], index: 4, kind: input, shape index: {}]   ;;  %s6404_s5 = inlined_call_operand.vmem [shape: f32[64,6], index: 5, kind: input, shape index: {}]   ;;  %s6405_s6 = inlined_call_operand.vmem [shape: f32[1,6], index: 6, kind: input, shape index: {}]   ;;  %s6406_s7 = inlined_call_operand.hbm [shape: f32[8,6], index: 7, kind: output, shape index: {}]  }
   0x1   :  { %v29_v0 = vld [vmem:[%s6400_s1 + $0x8] sm:$0xff]  ;;  %v28_v2 = vld [vmem:[%s6400_s1] sm:$0xff]  ;;  %142 = vmatprep.mubr.f32.mxu0 %v6418_v9  ;;  %685 = vmatprep.mubr.f32.mxu1 %v6418_v9  ;;  %v31_v58 = vld [vmem:[%s6400_s1 + $0x18] sm:$0xff] }
   0x2   :  { %v33_v1 = vld [vmem:[%s6400_s1 + $0x28] sm:$0xff]  ;;  %v70_v3 = vand.u32 4294901760, %v29_v0  ;;  %v32_v5 = vld [vmem:[%s6400_s1 + $0x20] sm:$0xff]  ;;  %v72_v6 = vand.u32 4294901760, %v28_v2  ;;  %v35_v59 = vld [vmem:[%s6400_s1 + $0x38] sm:$0xff] }
   0x3   :  { %v74_v4 = vand.u32 4294901760, %v33_v1  ;;  %v37_v7 = vld [vmem:[%s6400_s1 + $0x48] sm:$0xff]  ;;  %v76_v10 = vand.u32 4294901760, %v32_v5  ;;  %v36_v13 = vld [vmem:[%s6400_s1 + $0x40] sm:$0xff]  ;;  %v30_v60 = vld [vmem:[%s6400_s1 + $0x10] sm:$0xff] }
   0x4   :  { %v41_v8 = vld [vmem:[%s6400_s1 + $0x68] sm:$0xff]  ;;  %v78_v11 = vand.u32 4294901760, %v37_v7  ;;  %v40_v14 = vld [vmem:[%s6400_s1 + $0x60] sm:$0xff]  ;;  %v4807_v17 = vsub.f32 %v29_v0, %v70_v3  ;;  %v4811_v19 = vsub.f32 %v28_v2, %v72_v6  ;;  %v80_v25 = vand.u32 4294901760, %v36_v13  ;;  %v34_v0 = vld [vmem:[%s6400_s1 + $0x30] sm:$0xff] }
   0x5   :  { %v82_v12 = vand.u32 4294901760, %v41_v8  ;;  %v27_v15 = vld [vmem:[%s6399_s0] sm:$0xff]  ;;  %v4805_v16 = vpack.c.bf16 %v74_v4, %v70_v3  ;;  %v4809_v18 = vsub.f32 %v33_v1, %v74_v4  ;;  %v4813_v20 = vpack.c.bf16 %v76_v10, %v72_v6  ;;  %v39_v1 = vld [vmem:[%s6400_s1 + $0x58] sm:$0xff] }
   0x6   :  { %v4815_v21 = vsub.f32 %v32_v5, %v76_v10  ;;  %v4819_v23 = vsub.f32 %v37_v7, %v78_v11  ;;  %v84_v26 = vand.u32 4294901760, %v40_v14  ;;  %v68_v27 = vsel %vm66_vm0, %v27_v15, 0 }
   0x7   :  { %v4817_v22 = vpack.c.bf16 %v82_v12, %v78_v11  ;;  %4119 = vmatprep.subr.bf16.mxu0 %v4805_v16  ;;  %v4822_v24 = vsub.f32 %v41_v8, %v82_v12  ;;  %v4826_v28 = vand.u32 4294901760, %v68_v27  ;;  %v156_v29 = vand.u32 4294901760, %v4807_v17 }
   0x8   :  { %4121 = vmatpush1.bf16.msra.mxu0 %v4813_v20  ;;  %v168_v30 = vand.u32 4294901760, %v4809_v18  ;;  %v162_v31 = vand.u32 4294901760, %v4811_v19  ;;  %v4832_v32 = vpack.c.bf16 %v84_v26, %v80_v25  ;;  %v4834_v33 = vsub.f32 %v36_v13, %v80_v25 }
   0x9   :  { %4123 = vmatprep.subr.bf16.mxu0 %v4817_v22  ;;  %v4836_v34 = vsub.f32 %v40_v14, %v84_v26  ;;  %v174_v35 = vand.u32 4294901760, %v4815_v21  ;;  %v4840_v36 = vsub.f32 %v68_v27, %v4826_v28  ;;  %v157_v37 = vsub.f32 %v4807_v17, %v156_v29 }
   0xa   :  { %v169_v38 = vsub.f32 %v4809_v18, %v168_v30  ;;  %v163_v39 = vsub.f32 %v4811_v19, %v162_v31  ;;  %v180_v41 = vand.u32 4294901760, %v4819_v23  ;;  %v192_v42 = vand.u32 4294901760, %v4822_v24 }
   0xb   :  { %v175_v40 = vsub.f32 %v4815_v21, %v174_v35  ;;  %v186_v43 = vand.u32 4294901760, %v4834_v33  ;;  %v4859_v44 = vand.u32 4294901760, %v4840_v36  ;;  %v158_v45 = vand.u32 4294901760, %v157_v37 }
   0xc   :  { %4125 = vmatpush1.bf16.msra.mxu0 %v4832_v32  ;;  %v170_v46 = vand.u32 4294901760, %v169_v38  ;;  %v164_v47 = vand.u32 4294901760, %v163_v39  ;;  %v181_v49 = vsub.f32 %v4819_v23, %v180_v41  ;;  %v193_v50 = vsub.f32 %v4822_v24, %v192_v42 }
   0xd   :  { %v176_v48 = vand.u32 4294901760, %v175_v40  ;;  %v187_v51 = vsub.f32 %v4834_v33, %v186_v43  ;;  %v146_v52 = vsub.f32 %v4840_v36, %v4859_v44  ;;  %v198_v54 = vand.u32 4294901760, %v4836_v34 }
   0xe   :  { %v4126_v53 = vpack.c.bf16 %v170_v46, %v158_v45  ;;  %v182_v56 = vand.u32 4294901760, %v181_v49  ;;  %v194_v57 = vand.u32 4294901760, %v193_v50 }
   0xf   :  { %v4128_v55 = vpack.c.bf16 %v176_v48, %v164_v47  ;;  %v4882_v61 = vand.u32 4294901760, %v146_v52  ;;  %v188_v62 = vand.u32 4294901760, %v187_v51  ;;  %v199_v63 = vsub.f32 %v4836_v34, %v198_v54 }
  0x10   :  { %4127 = vmatprep.subr.bf16.mxu0 %v4126_v53 }
  0x11   :  { %12 = vsyncpa [#allocation3], 0  ;;  %v4130_v2 = vpack.c.bf16 %v194_v57, %v182_v56  ;;  %v4134_v3 = vpack.c.bf16 %v4809_v18, %v4807_v17  ;;  %v4136_v4 = vpack.c.bf16 %v4815_v21, %v4811_v19  ;;  %v43_v5 = vld [vmem:[%s6400_s1 + $0x78] sm:$0xff]  ;;  %v38_v6 = vld [vmem:[%s6400_s1 + $0x50] sm:$0xff]  ;;  %148 = vmatmul.mubr.f32.vlgmr.msra.gmra.mrb[0].mxu0 %v4882_v61  ;;  %v200_v7 = vand.u32 4294901760, %v199_v63  ;;  %s4735_s27 = smov [#allocation2]  }
  0x12   :  { %v4138_v8 = vpack.c.bf16 %v4822_v24, %v4819_v23  ;;  %v4140_v10 = vpack.c.bf16 %v4836_v34, %v4834_v33  ;;  %v613_v11 = vand.u32 4294901760, %v31_v58  ;;  %4129 = vmatpush1.bf16.msra.mxu0 %v4128_v55  ;;  %258 = vmatprep.mubr.f32.mxu0 %v6418_v9  ;;  %v617_v12 = vand.u32 4294901760, %v35_v59  ;;  %v42_v37 = vld [vmem:[%s6400_s1 + $0x70] sm:$0xff]  ;;  %v5007_v19 = vld [vmem:[%s6402_s3 + $0x80] sm:$0xff]  ;;  %v5012_v21 = vld [vmem:[%s6402_s3 + $0x88] sm:$0xff]  ;;  %s3520_s28 = sshll.u32 %s4735_s27, 4  ;;  %s3521_s28 = int_to_ptr.vmem [resolvable:$true] %s3520_s28 }
  0x13   :  { %v615_v13 = vand.u32 4294901760, %v30_v60  ;;  %v619_v14 = vand.u32 4294901760, %v34_v0  ;;  %v621_v15 = vand.u32 4294901760, %v39_v1  ;;  %4131 = vmatprep.subr.bf16.mxu0 %v4130_v2  ;;  %v4132_v25 = vpack.c.bf16 %v200_v7, %v188_v62  ;;  %v5023_v24 = vld [vmem:[%s6402_s3] sm:$0xff]  ;;  %v5035_v33 = vld [vmem:[%s6402_s3 + $0x90] sm:$0xff]  ;;  %v5040_v34 = vld [vmem:[%s6402_s3 + $0x98] sm:$0xff]  ;;  %p4713_p1 = scmp.lt.s32.totalorder %s3521_s28, %s3521_s28 }
  0x14   :  { %v4909_v26 = vsub.f32 %v31_v58, %v613_v11  ;;  %v625_v27 = vand.u32 4294901760, %v43_v5  ;;  %v623_v38 = vand.u32 4294901760, %v38_v6  ;;  %v4914_v39 = vpack.c.bf16 %v617_v12, %v613_v11  ;;  %s4708_s29 = scalar_lea.vmem %s3521_s28, 128 }
  0x15   :  { %v4916_v40 = vsub.f32 %v35_v59, %v617_v12  ;;  %v4918_v45 = vpack.c.bf16 %v619_v14, %v615_v13  ;;  %v4920_v46 = vsub.f32 %v30_v60, %v615_v13  ;;  %v4922_v47 = vsub.f32 %v34_v0, %v619_v14  ;;  %p4709_p0 = scmp.ne.s32.totalorder %s3521_s28, %s4708_s29  ;;  %p4714_p2 = scmp.lt.s32.totalorder %s4708_s29, %s4708_s29 }
  0x16   :  { %v4924_v48 = vpack.c.bf16 %v625_v27, %v621_v15  ;;  %v4926_v49 = vsub.f32 %v39_v1, %v621_v15  ;;  %v4928_v50 = vsub.f32 %v43_v5, %v625_v27  ;;  %4133 = vmatpush1.bf16.msra.mxu0 %v4132_v25  ;;  %4167 = vmatprep.subr.bf16.mxu1 %v4914_v39  ;;  %v627_v51 = vand.u32 4294901760, %v42_v37 }
  0x17   :  { %v4931_v52 = vsub.f32 %v38_v6, %v623_v38  ;;  %v699_v53 = vand.u32 4294901760, %v4909_v26  ;;  %v711_v55 = vand.u32 4294901760, %v4916_v40  ;;  %4135 = vmatprep.subr.bf16.mxu0 %v4134_v3  ;;  %4169 = vmatpush1.bf16.msra.mxu1 %v4918_v45  ;;  %v705_v56 = vand.u32 4294901760, %v4920_v46  ;;  %p4715_p3 = por %p4714_p2, %p4713_p1 }
  0x18   :  { %v717_v57 = vand.u32 4294901760, %v4922_v47  ;;  %v723_v58 = vand.u32 4294901760, %v4926_v49  ;;  %v735_v59 = vand.u32 4294901760, %v4928_v50  ;;  %4171 = vmatprep.subr.bf16.mxu1 %v4924_v48  ;;  %v4941_v60 = vpack.c.bf16 %v627_v51, %v623_v38 }
  0x19   :  { %v4943_v62 = vsub.f32 %v42_v37, %v627_v51  ;;  %v700_v63 = vsub.f32 %v4909_v26, %v699_v53  ;;  %v712_v0 = vsub.f32 %v4916_v40, %v711_v55  ;;  %260 = vmatmul.mubr.f32.vlgmr.msra.gmra.mrb[0].mxu0 %v4826_v28  ;;  %v706_v1 = vsub.f32 %v4920_v46, %v705_v56  ;;  %p4716_p4 = pnand %p4715_p3, %p4709_p0 }
  0x1a   :  { %v718_v2 = vsub.f32 %v4922_v47, %v717_v57  ;;  %v724_v3 = vsub.f32 %v4926_v49, %v723_v58  ;;  %v736_v5 = vsub.f32 %v4928_v50, %v735_v59  ;;  %4137 = vmatpush1.bf16.msra.mxu0 %v4136_v4  ;;  %346 = vmatprep.mubr.f32.mxu0 %v6418_v9  ;;  %v729_v11 = vand.u32 4294901760, %v4931_v52 }
  0x1b   :  { %v701_v6 = vand.u32 4294901760, %v700_v63  ;;  %v713_v7 = vand.u32 4294901760, %v712_v0  ;;  %v741_v12 = vand.u32 4294901760, %v4943_v62  ;;  %4139 = vmatprep.subr.bf16.mxu0 %v4138_v8  ;;  %4173 = vmatpush1.bf16.msra.mxu1 %v4941_v60  ;;  %v707_v13 = vand.u32 4294901760, %v706_v1 }
  0x1c   :  { %v719_v14 = vand.u32 4294901760, %v718_v2  ;;  %v725_v15 = vand.u32 4294901760, %v724_v3  ;;  %v737_v25 = vand.u32 4294901760, %v736_v5  ;;  %v730_v4 = vsub.f32 %v4931_v52, %v729_v11 }
  0x1d   :  { %v4174_v27 = vpack.c.bf16 %v713_v7, %v701_v6  ;;  %v742_v37 = vsub.f32 %v4943_v62, %v741_v12  ;;  %v4182_v1 = vpack.c.bf16 %v4916_v40, %v4909_v26  ;;  %v4186_v2 = vpack.c.bf16 %v4928_v50, %v4926_v49  ;;  %v5067_v7 = vld [vmem:[%s6402_s3 + $0x18] sm:$0xff] }
  0x1e   :  { %v4176_v38 = vpack.c.bf16 %v719_v14, %v707_v13  ;;  %v4178_v51 = vpack.c.bf16 %v737_v25, %v725_v15  ;;  %4141 = vmatpush1.bf16.msra.mxu0 %v4140_v10  ;;  %691 = vmatmul.mubr.f32.vlgmr.msra.gmra.mrb[0].mxu1 %v4882_v61  ;;  %v731_v8 = vand.u32 4294901760, %v730_v4  ;;  %v4150_v61 = vpack.c.bf16 %v168_v30, %v156_v29  ;;  %v5028_v29 = vld [vmem:[%s6402_s3 + $0x8] sm:$0xff]  ;;  %v5119_v4 = vld [vmem:[%s6402_s3 + $0x20] sm:$0xff] }
  0x1f   :  { %v743_v63 = vand.u32 4294901760, %v742_v37  ;;  %4143 = vmatprep.subr.bf16.mxu0 %v4805_v16  ;;  %4175 = vmatprep.subr.bf16.mxu1 %v4174_v27  ;;  %v4184_v10 = vpack.c.bf16 %v4922_v47, %v4920_v46  ;;  %v4152_v3 = vpack.c.bf16 %v174_v35, %v162_v31  ;;  %v4154_v17 = vpack.c.bf16 %v192_v42, %v180_v41  ;;  %v5124_v37 = vld [vmem:[%s6402_s3 + $0x28] sm:$0xff] }
  0x20   :  { %4177 = vmatpush1.bf16.msra.mxu1 %v4176_v38  ;;  %801 = vmatprep.mubr.f32.mxu1 %v6418_v9  ;;  %v4188_v18 = vpack.c.bf16 %v4943_v62, %v4931_v52  ;;  %v4156_v23 = vpack.c.bf16 %v198_v54, %v186_v43  ;;  %v1280_v30 = vand.u32 4294901760, %v5007_v19  ;;  %v1283_v31 = vand.u32 4294901760, %v5012_v21  ;;  %v5050_v54 = vld [vmem:[%s6402_s3 + $0x10] sm:$0xff] }
  0x21   :  { %v4180_v0 = vpack.c.bf16 %v743_v63, %v731_v8  ;;  %349 = vmatmul.mubr.f32.vlgmr.msra.gmra.mrb[0].mxu0 %v4840_v36  ;;  %4179 = vmatprep.subr.bf16.mxu1 %v4178_v51  ;;  %v1232_v35 = vand.u32 4294901760, %v5023_v24  ;;  %v1235_v41 = vand.u32 4294901760, %v5028_v29  ;;  %v1286_v42 = vand.u32 4294901760, %v5035_v33  ;;  %v5134_v38 = vld [vmem:[%s6402_s3 + $0xb0] sm:$0xff]  ;;  %v5139_v51 = vld [vmem:[%s6402_s3 + $0xb8] sm:$0xff] }
  0x22   :  { %4145 = vmatpush1.bf16.msra.mxu0 %v4813_v20  ;;  %427 = vmatprep.mubr.f32.mxu0 %v6418_v9  ;;  %v1289_v43 = vand.u32 4294901760, %v5040_v34  ;;  %v5057_v5 = vsub.f32 %v5007_v19, %v1280_v30  ;;  %v5062_v6 = vsub.f32 %v5012_v21, %v1283_v31  ;;  %v4198_v13 = vpack.c.bf16 %v711_v55, %v699_v53 }
  0x23   :  { %4147 = vmatprep.subr.bf16.mxu0 %v4817_v22  ;;  %v5090_v14 = vsub.f32 %v5023_v24, %v1232_v35  ;;  %v5095_v15 = vsub.f32 %v5028_v29, %v1235_v41  ;;  %v1238_v25 = vand.u32 4294901760, %v5050_v54  ;;  %v5103_v26 = vsub.f32 %v5035_v33, %v1286_v42 }
  0x24   :  { %4181 = vmatpush1.bf16.msra.mxu1 %v4180_v0  ;;  %v5108_v40 = vsub.f32 %v5040_v34, %v1289_v43  ;;  %v6417_v53 = vand.u32 4294901760, %v5067_v7  ;;  %v4278_v55 = vpack.c.bf16 %v5062_v6, %v5057_v5  ;;  %v4202_v8 = vpack.c.bf16 %v735_v59, %v723_v58  ;;  %v5165_v58 = vld [vmem:[%s6402_s3 + $0x30] sm:$0xff] }
  0x25   :  { %4183 = vmatprep.subr.bf16.mxu1 %v4182_v1  ;;  %v4280_v46 = vpack.c.bf16 %v5095_v15, %v5090_v14  ;;  %v5150_v47 = vsub.f32 %v5050_v54, %v1238_v25  ;;  %v6413_v50 = vand.u32 4294901760, %v5119_v4  ;;  %v6408_v0 = vand.u32 4294901760, %v5134_v38 }
  0x26   :  { %4149 = vmatpush1.bf16.msra.mxu0 %v4832_v32  ;;  %v5158_v49 = vsub.f32 %v5067_v7, %v6417_v53  ;;  %v6407_v1 = vand.u32 4294901760, %v5139_v51  ;;  %v6503_v33 = vand.u32 4294901760, %v5067_v7  ;;  %v6507_v54 = vand.u32 4294901760, %v5124_v37 }
  0x27   :  { %4151 = vmatprep.subr.bf16.mxu0 %v4150_v61  ;;  %803 = vmatmul.mubr.f32.vlgmr.msra.gmra.mrb[0].mxu1 %v4826_v28  ;;  %v5188_v61 = vld [vmem:[%s6402_s3 + $0xc0] sm:$0xff]  ;;  %v5208_v62 = vsub.f32 %v5119_v4, %v6413_v50  ;;  %v5282_v50 = vld [vmem:[%s6402_s3 + $0x50] sm:$0xff]  ;;  %vm4734_vm1 = vmmov 0   ;;  %vm2971_vm2 = vcmask 523264   ;;  %vm3512_vm3 = vcmask 48128  }
  0x28   :  { %4185 = vmatpush1.bf16.msra.mxu1 %v4184_v10  ;;  %889 = vmatprep.mubr.f32.mxu1 %v6418_v9  ;;  %v5198_v10 = vld [vmem:[%s6402_s3 + $0xc8] sm:$0xff]  ;;  %v4284_v52 = vpack.c.bf16 %v5158_v49, %v5150_v47  ;;  %v5354_v34 = vpack.c.bf16 %v6503_v33, %v1238_v25 }
  0x29   :  { %431 = vmatmul.mubr.f32.vlgmr.msra.gmra.mrb[0].mxu0 %v4859_v44  ;;  %4187 = vmatprep.subr.bf16.mxu1 %v4186_v2  ;;  %v6411_v2 = vand.u32 4294901760, %v5165_v58  ;;  %v6516_v33 = vand.u32 4294901760, %v5198_v10 }
  0x2a   :  { %4153 = vmatpush1.bf16.msra.mxu0 %v4152_v3  ;;  %525 = vmatprep.mubr.f32.mxu0 %v6418_v9 }
  0x2b   :  { %4155 = vmatprep.subr.bf16.mxu0 %v4154_v17 }
  0x2c   :  { %4189 = vmatpush1.bf16.msra.mxu1 %v4188_v18  ;;  %v5221_v18 = vsub.f32 %v5134_v38, %v6408_v0 }
  0x2d   :  { %4191 = vmatprep.subr.bf16.mxu1 %v4914_v39 }
  0x2e   :  { %4157 = vmatpush1.bf16.msra.mxu0 %v4156_v23  ;;  %v5226_v23 = vsub.f32 %v5139_v51, %v6407_v1 }
  0x2f   :  { %4159 = vmatprep.subr.bf16.mxu0 %v4805_v16  ;;  %892 = vmatmul.mubr.f32.vlgmr.msra.gmra.mrb[0].mxu1 %v4840_v36  ;;  %v5074_v16 = vld [vmem:[%s6402_s3 + $0xa0] sm:$0xff]  ;;  %v5079_v36 = vld [vmem:[%s6402_s3 + $0xa8] sm:$0xff] }
  0x30   :  { %4193 = vmatpush1.bf16.msra.mxu1 %v4918_v45  ;;  %970 = vmatprep.mubr.f32.mxu1 %v6418_v9  ;;  %v6415_v27 = vand.u32 4294901760, %v5079_v36 }
  0x31   :  { %527 = vmatmul.mubr.f32.vlgmr.msra.gmra.mrb[0].mxu0 %v4826_v28  ;;  %4195 = vmatprep.subr.bf16.mxu1 %v4924_v48 }
  0x32   :  { %4161 = vmatpush1.bf16.msra.mxu0 %v4813_v20  ;;  %605 = vmatprep.mubr.f32.mxu0 %v6418_v9  ;;  %v6416_v20 = vand.u32 4294901760, %v5074_v16  ;;  %v5181_v63 = vsub.f32 %v5079_v36, %v6415_v27 }
  0x33   :  { %4163 = vmatprep.subr.bf16.mxu0 %v4817_v22  ;;  %v4200_v22 = vpack.c.bf16 %v717_v57, %v705_v56  ;;  %v4282_v56 = vpack.c.bf16 %v5108_v40, %v5103_v26  ;;  %v6409_v57 = vand.u32 4294901760, %v5124_v37 }
  0x34   :  { %4197 = vmatpush1.bf16.msra.mxu1 %v4941_v60  ;;  %v5176_v59 = vsub.f32 %v5074_v16, %v6416_v20 }
  0x35   :  { %4199 = vmatprep.subr.bf16.mxu1 %v4198_v13  ;;  %v6414_v13 = vand.u32 4294901760, %v5198_v10 }
  0x36   :  { %4165 = vmatpush1.bf16.msra.mxu0 %v4832_v32  ;;  %v5170_v32 = vld [vmem:[%s6402_s3 + $0x38] sm:$0xff]  ;;  %v4286_v17 = vpack.c.bf16 %v5181_v63, %v5176_v59 }
  0x37   :  { %974 = vmatmul.mubr.f32.vlgmr.msra.gmra.mrb[0].mxu1 %v4859_v44  ;;  %4279 = vmatprep.subr.bf16.mxu0 %v4278_v55  ;;  %v4204_v44 = vpack.c.bf16 %v741_v12, %v729_v11  ;;  %v6410_v3 = vand.u32 4294901760, %v5170_v32  ;;  %v5213_v11 = vsub.f32 %v5124_v37, %v6409_v57  ;;  %v6412_v12 = vand.u32 4294901760, %v5188_v61  ;;  %v5232_v55 = vld [vmem:[%s6402_s3 + $0x40] sm:$0xff] }
  0x38   :  { %4201 = vmatpush1.bf16.msra.mxu1 %v4200_v22  ;;  %1068 = vmatprep.mubr.f32.mxu1 %v6418_v9  ;;  %v5237_v22 = vld [vmem:[%s6402_s3 + $0x48] sm:$0xff]  ;;  %v1188_v37 = vld [vmem:[%s6402_s3 + $0xe0] sm:$0xff] }
  0x39   :  { %607 = vmatmul.mubr.f32.vlgmr.msra.gmra.mrb[0].mxu0 %v4826_v28  ;;  %4203 = vmatprep.subr.bf16.mxu1 %v4202_v8  ;;  %v5242_v8 = vld [vmem:[%s6402_s3 + $0xd0] sm:$0xff]  ;;  %v4288_v1 = vpack.c.bf16 %v5213_v11, %v5208_v62  ;;  %v5265_v0 = vsub.f32 %v5188_v61, %v6412_v12  ;;  %v1259_v57 = vand.u32 4294901760, %v5237_v22 }
  0x3a   :  { %4281 = vmatpush3.bf16.msra.mxu0 %v4280_v46  ;;  %v5247_v46 = vld [vmem:[%s6402_s3 + $0xd8] sm:$0xff] }
  0x3b   :  { %4283 = vmatprep.subr.bf16.mxu0 %v4282_v56  ;;  %v5253_v56 = vsub.f32 %v5165_v58, %v6411_v2  ;;  %v1310_v2 = vand.u32 4294901760, %v5242_v8  ;;  %v1313_v12 = vand.u32 4294901760, %v5247_v46  ;;  %v5304_v53 = vsub.f32 %v5237_v22, %v1259_v57 }
  0x3c   :  { %4205 = vmatpush1.bf16.msra.mxu1 %v4204_v44  ;;  %v5258_v44 = vsub.f32 %v5170_v32, %v6410_v3  ;;  %v4290_v3 = vpack.c.bf16 %v5226_v23, %v5221_v18 }
  0x3d   :  { %4207 = vmatprep.subr.bf16.mxu1 %v4914_v39  ;;  %v1256_v39 = vand.u32 4294901760, %v5232_v55  ;;  %v5313_v21 = vsub.f32 %v5242_v8, %v1310_v2 }
  0x3e   :  { %4285 = vmatpush3.bf16.msra.mxu0 %v4284_v52  ;;  %v5275_v52 = vsub.f32 %v5198_v10, %v6414_v13  ;;  %v5296_v13 = vpack.c.bf16 %v1283_v31, %v1280_v30  ;;  %v4292_v27 = vpack.c.bf16 %v5258_v44, %v5253_v56  ;;  %v5318_v30 = vsub.f32 %v5247_v46, %v1313_v12 }
  0x3f   :  { %1070 = vmatmul.mubr.f32.vlgmr.msra.gmra.mrb[0].mxu1 %v4826_v28  ;;  %4287 = vmatprep.subr.bf16.mxu0 %v4286_v17  ;;  %v5287_v17 = vld [vmem:[%s6402_s3 + $0x58] sm:$0xff]  ;;  %v5301_v20 = vsub.f32 %v5232_v55, %v1256_v39  ;;  %v5325_v31 = vpack.c.bf16 %v1235_v41, %v1232_v35  ;;  %v6504_v35 = vand.u32 4294901760, %v5074_v16  ;;  %v6505_v41 = vand.u32 4294901760, %v5079_v36 }
  0x40   :  { %4209 = vmatpush1.bf16.msra.mxu1 %v4918_v45  ;;  %1148 = vmatprep.mubr.f32.mxu1 %v6418_v9  ;;  %v1262_v45 = vand.u32 4294901760, %v5282_v50  ;;  %v4294_v19 = vpack.c.bf16 %v5275_v52, %v5265_v0  ;;  %v4298_v29 = vpack.c.bf16 %v5318_v30, %v5313_v21  ;;  %v6509_v16 = vand.u32 4294901760, %v5134_v38  ;;  %v1189_v38 = vld [vmem:[%s6402_s3 + $0xe8] sm:$0xff] }
  0x41   :  { %4211 = vmatprep.subr.bf16.mxu1 %v4924_v48  ;;  %v1265_v48 = vand.u32 4294901760, %v5287_v17  ;;  %v6510_v36 = vand.u32 4294901760, %v5139_v51  ;;  %v6513_v55 = vand.u32 4294901760, %v5170_v32  ;;  %v1316_v51 = vand.u32 4294901760, %v1188_v37  ;;  %v1173_v32 = vld [vmem:[%s6402_s3 + $0x68] sm:$0xff] }
  0x42   :  { %4289 = vmatpush3.bf16.msra.mxu0 %v4288_v1  ;;  %v5332_v1 = vpack.c.bf16 %v1289_v43, %v1286_v42  ;;  %v5361_v42 = vpack.c.bf16 %v6505_v41, %v6504_v35  ;;  %v6506_v43 = vand.u32 4294901760, %v5119_v4  ;;  %v1319_v22 = vand.u32 4294901760, %v1189_v38 }
  0x43   :  { %4291 = vmatprep.subr.bf16.mxu0 %v4290_v3  ;;  %v4296_v3 = vpack.c.bf16 %v5304_v53, %v5301_v20  ;;  %v5344_v24 = vsub.f32 %v5287_v17, %v1265_v48  ;;  %v5377_v25 = vpack.c.bf16 %v6510_v36, %v6509_v16  ;;  %v1541_v41 = vsub.f32 %v1188_v37, %v1316_v51  ;;  %v1190_v36 = vld [vmem:[%s6402_s3 + $0xf0] sm:$0xff] }
  0x44   :  { %4213 = vmatpush1.bf16.msra.mxu1 %v4941_v60  ;;  %v5339_v60 = vsub.f32 %v5282_v50, %v1262_v45  ;;  %v5370_v7 = vpack.c.bf16 %v6507_v54, %v6506_v43  ;;  %v5406_v43 = vpack.c.bf16 %v1259_v57, %v1256_v39  ;;  %v1322_v10 = vand.u32 4294901760, %v1190_v36  ;;  %v1174_v57 = vld [vmem:[%s6402_s3 + $0x70] sm:$0xff]  ;;  %v1175_v39 = vld [vmem:[%s6402_s3 + $0x78] sm:$0xff] }
  0x45   :  { %4215 = vmatprep.subr.bf16.mxu1 %v5296_v13  ;;  %6511 = vst [vmem:[#allocation6_spill] sm:$0xff] %v5377_v25  ;;  %v5432_v9 = vpack.c.bf16 %v1265_v48, %v1262_v45  ;;  %v1465_v46 = vand.u32 4294901760, %v5062_v6 }
  0x46   :  { %4293 = vmatpush3.bf16.msra.mxu0 %v4292_v27  ;;  %6508 = vst [vmem:[#allocation5_spill] sm:$0xff] %v5370_v7  ;;  %v6512_v27 = vand.u32 4294901760, %v5165_v58  ;;  %v1172_v58 = vld [vmem:[%s6402_s3 + $0x60] sm:$0xff]  ;;  %6518 = vst [vmem:[#allocation9_spill] sm:$0xff] %v5406_v43 }
  0x47   :  { %1150 = vmatmul.mubr.f32.vlgmr.msra.gmra.mrb[0].mxu1 %v4826_v28  ;;  %4295 = vmatprep.subr.bf16.mxu0 %v4294_v19  ;;  %v4300_v28 = vpack.c.bf16 %v5344_v24, %v5339_v60  ;;  %v1268_v19 = vand.u32 4294901760, %v1172_v58  ;;  %6520 = vst [vmem:[#allocation11_spill] sm:$0xff] %v5432_v9 }
  0x48   :  { %4217 = vmatpush3.bf16.msra.mxu1 %v5325_v31  ;;  %v5384_v4 = vpack.c.bf16 %v6513_v55, %v6512_v27  ;;  %v1191_v27 = vld [vmem:[%s6402_s3 + $0xf8] sm:$0xff] }
  0x49   :  { %4219 = vmatprep.subr.bf16.mxu1 %v5332_v1  ;;  %v1429_v54 = vsub.f32 %v1172_v58, %v1268_v19  ;;  %v1325_v55 = vand.u32 4294901760, %v1191_v27  ;;  %v1277_v58 = vand.u32 4294901760, %v1175_v39 }
  0x4a   :  { %4297 = vmatpush3.bf16.msra.mxu0 %v4296_v3  ;;  %6514 = vst [vmem:[#allocation7_spill] sm:$0xff] %v5384_v4  ;;  %v1271_v3 = vand.u32 4294901760, %v1173_v32 }
  0x4b   :  { %4299 = vmatprep.subr.bf16.mxu0 %v4298_v29  ;;  %v6515_v29 = vand.u32 4294901760, %v5188_v61  ;;  %v5444_v45 = vpack.c.bf16 %v1325_v55, %v1322_v10 }
  0x4c   :  { %4221 = vmatpush3.bf16.msra.mxu1 %v5354_v34  ;;  %v1436_v16 = vsub.f32 %v1173_v32, %v1271_v3  ;;  %v5426_v32 = vpack.c.bf16 %v1313_v12, %v1310_v2  ;;  %v5436_v2 = vpack.c.bf16 %v1319_v22, %v1316_v51  ;;  %v1458_v12 = vand.u32 4294901760, %v5057_v5 }
  0x4d   :  { %4223 = vmatprep.subr.bf16.mxu1 %v5361_v42  ;;  %v5404_v35 = vpack.c.bf16 %v6516_v33, %v6515_v29  ;;  %v1555_v29 = vsub.f32 %v1190_v36, %v1322_v10  ;;  %v1562_v33 = vsub.f32 %v1191_v27, %v1325_v55  ;;  %v5440_v50 = vpack.c.bf16 %v1271_v3, %v1268_v19 }
  0x4e   :  { %4301 = vmatpush3.bf16.msra.mxu0 %v4300_v28  ;;  %v1548_v28 = vsub.f32 %v1189_v38, %v1319_v22  ;;  %v4304_v37 = vpack.c.bf16 %v1436_v16, %v1429_v54  ;;  %v1274_v38 = vand.u32 4294901760, %v1174_v57  ;;  %6519 = vst [vmem:[#allocation10_spill] sm:$0xff] %v5426_v32  ;;  %6521 = vst [vmem:[#allocation12_spill] sm:$0xff] %v5436_v2  ;;  %v1542_v27 = vand.u32 4294901760, %v1541_v41 }
  0x4f   :  { %6517 = vst [vmem:[#allocation8_spill] sm:$0xff] %v5404_v35  ;;  %6522 = vst [vmem:[#allocation13_spill] sm:$0xff] %v5440_v50  ;;  %v4342_v17 = vpack.c.bf16 %v1465_v46, %v1458_v12  ;;  %v1459_v48 = vsub.f32 %v5057_v5, %v1458_v12  ;;  %v1466_v51 = vsub.f32 %v5062_v6, %v1465_v46  ;;  %v1556_v5 = vand.u32 4294901760, %v1555_v29 }
  0x50   :  { %4225 = vmatpush3.bf16.msra.mxu1 %v5370_v7  ;;  %v4302_v61 = vpack.c.bf16 %v1548_v28, %v1541_v41  ;;  %6523 = vst [vmem:[#allocation14_spill] sm:$0xff] %v5444_v45  ;;  %v5447_v36 = vpack.c.bf16 %v1277_v58, %v1274_v38  ;;  %v1514_v7 = vand.u32 4294901760, %v5265_v0 }
  0x51   :  { %4227 = vmatprep.subr.bf16.mxu1 %v5377_v25  ;;  %v1460_v22 = vand.u32 4294901760, %v1459_v48  ;;  %v1467_v19 = vand.u32 4294901760, %v1466_v51 }
  0x52   :  { %4303 = vmatprep.subr.bf16.mxu0 %v4302_v61  ;;  %v4306_v61 = vpack.c.bf16 %v1562_v33, %v1555_v29  ;;  %6524 = vst [vmem:[#allocation15_spill] sm:$0xff] %v5447_v36 }
  0x53   :  { %4305 = vmatpush3.bf16.msra.mxu0 %v4304_v37  ;;  %v4246_v3 = vpack.c.bf16 %v1467_v19, %v1460_v22  ;;  %v1437_v37 = vand.u32 4294901760, %v1436_v16 }
  0x54   :  { %4229 = vmatpush3.bf16.msra.mxu1 %v5384_v4  ;;  %4307 = vmatprep.subr.bf16.mxu0 %v4306_v61  ;;  %v1543_v61 = vsub.f32 %v1541_v41, %v1542_v27 }
  0x55   :  { %4231 = vmatprep.subr.bf16.mxu1 %v5404_v35  ;;  %v1450_v35 = vsub.f32 %v1175_v39, %v1277_v58  ;;  %v1430_v39 = vand.u32 4294901760, %v1429_v54  ;;  %v1438_v51 = vsub.f32 %v1436_v16, %v1437_v37  ;;  %v46_v16 = vlaneseq }
  0x56   :  { %v1544_v48 = vand.u32 4294901760, %v1543_v61  ;;  %v1472_v61 = vand.u32 4294901760, %v5103_v26 }
  0x57   :  { %v5454_v55 = vpack.c.bf16 %v1437_v37, %v1430_v39  ;;  %v1451_v6 = vand.u32 4294901760, %v1450_v35  ;;  %v1431_v46 = vsub.f32 %v1429_v54, %v1430_v39  ;;  %v5468_v39 = vshrl.u32 %v46_v16, 7 }
  0x58   :  { %4233 = vmatpush3.bf16.msra.mxu1 %v5406_v43  ;;  %v1443_v43 = vsub.f32 %v1174_v57, %v1274_v38  ;;  %v1549_v57 = vand.u32 4294901760, %v1548_v28  ;;  %v1563_v38 = vand.u32 4294901760, %v1562_v33  ;;  %v1473_v16 = vsub.f32 %v5103_v26, %v1472_v61 }
  0x59   :  { %4235 = vmatprep.subr.bf16.mxu1 %v5426_v32  ;;  %v1432_v19 = vand.u32 4294901760, %v1431_v46  ;;  %v1452_v41 = vsub.f32 %v1450_v35, %v1451_v6  ;;  %v1360_v46 = vand.u32 4294901760, %v5150_v47 }
  0x5a   :  { %v4308_v8 = vpack.c.bf16 %v1450_v35, %v1443_v43  ;;  %v5452_v10 = vpack.c.bf16 %v1549_v57, %v1542_v27  ;;  %v1444_v58 = vand.u32 4294901760, %v1443_v43  ;;  %v1550_v12 = vsub.f32 %v1548_v28, %v1549_v57 }
  0x5b   :  { %v1453_v28 = vand.u32 4294901760, %v1452_v41  ;;  %v1374_v41 = vand.u32 4294901760, %v5208_v62 }
  0x5c   :  { %4237 = vmatpush3.bf16.msra.mxu1 %v5432_v9  ;;  %4309 = vmatpush3.bf16.msra.mxu0 %v4308_v8  ;;  %v5456_v8 = vpack.c.bf16 %v1563_v38, %v1556_v5  ;;  %v1551_v22 = vand.u32 4294901760, %v1550_v12  ;;  %v1479_v12 = vand.u32 4294901760, %v5108_v40 }
  0x5d   :  { %4239 = vmatprep.subr.bf16.mxu1 %v5436_v2  ;;  %4343 = vmatprep.subr.bf16.mxu0 %v4342_v17  ;;  %v5458_v17 = vpack.c.bf16 %v1451_v6, %v1444_v58  ;;  %v1445_v2 = vsub.f32 %v1443_v43, %v1444_v58  ;;  %v5474_v43 = vld [vmem:[%s6401_s2] sm:$0xf] }
  0x5f   :  { %v1446_v4 = vand.u32 4294901760, %v1445_v2 }
  0x60   :  { %4241 = vmatpush3.bf16.msra.mxu1 %v5440_v50  ;;  %v1564_v50 = vsub.f32 %v1562_v33, %v1563_v38  ;;  %v52_v33 = vsub.s32 1, %v5468_v39 }
  0x61   :  { %4243 = vmatprep.subr.bf16.mxu1 %v5444_v45  ;;  %v5460_v45 = vpack.c.bf16 %v1551_v22, %v1544_v48  ;;  %v5466_v57 = vpack.c.bf16 %v1453_v28, %v1446_v4  ;;  %v1353_v4 = vand.u32 4294901760, %v5095_v15  ;;  %v1381_v28 = vand.u32 4294901760, %v5213_v11 }
  0x62   :  { %v1565_v27 = vand.u32 4294901760, %v1564_v50  ;;  %v53_v2 = vrot.slane %v5474_v43, %v52_v33 }
  0x63   :  { %v1354_v37 = vsub.f32 %v5095_v15, %v1353_v4  ;;  %v1493_v15 = vand.u32 4294901760, %v5181_v63 }
  0x64   :  { %4245 = vmatpush3.bf16.msra.mxu1 %v5447_v36  ;;  %v1557_v36 = vsub.f32 %v1555_v29, %v1556_v5  ;;  %v48_v29 = vsub.s32 0, %v5468_v39 }
  0x65   :  { %4247 = vmatprep.subr.bf16.mxu1 %v4246_v3  ;;  %v1439_v3 = vand.u32 4294901760, %v1438_v51  ;;  %v1367_v51 = vand.u32 4294901760, %v5158_v49 }
  0x66   :  { %v1558_v32 = vand.u32 4294901760, %v1557_v36  ;;  %v49_v35 = vrot.slane %v5474_v43, %v48_v29  ;;  %v1480_v29 = vsub.f32 %v5108_v40, %v1479_v12 }
  0x67   :  { %v5462_v9 = vpack.c.bf16 %v1439_v3, %v1432_v19  ;;  %v1355_v19 = vand.u32 4294901760, %v1354_v37  ;;  %v4348_v37 = vpack.c.bf16 %v1367_v51, %v1360_v46  ;;  %v1368_v26 = vsub.f32 %v5158_v49, %v1367_v51 }
  0x68   :  { %v5464_v54 = vpack.c.bf16 %v1565_v27, %v1558_v32  ;;  %v1346_v32 = vand.u32 4294901760, %v5090_v14  ;;  %v1507_v51 = vand.u32 4294901760, %v5226_v23 }
  0x6a   :  { %v1347_v36 = vsub.f32 %v5090_v14, %v1346_v32  ;;  %v1486_v14 = vand.u32 4294901760, %v5176_v59 }
  0x6c   :  { %v1348_v22 = vand.u32 4294901760, %v1347_v36  ;;  %v4346_v36 = vpack.c.bf16 %v1479_v12, %v1472_v61  ;;  %v4350_v25 = vpack.c.bf16 %v1493_v15, %v1486_v14  ;;  %v1487_v12 = vsub.f32 %v5176_v59, %v1486_v14 }
  0x6d   :  { %v1395_v59 = vand.u32 4294901760, %v5258_v44 }
 0x10c   :  { %v608_v50 = vpop.f32.mrb[0].mxu0 }
 0x10d   :  { %v4670_v5 = vadd.f32 %v608_v50, %v49_v35  ;;  %v610_v38 = vpop.f32.mrb[1].mxu0  ;;  %v4344_v35 = vpack.c.bf16 %v1353_v4, %v1346_v32  ;;  %v4352_v32 = vpack.c.bf16 %v1381_v28, %v1374_v41  ;;  %v1474_v4 = vand.u32 4294901760, %v1473_v16 }
 0x10e   :  { %v4671_v58 = vadd.f32 %v610_v38, %v53_v2  ;;  %v1361_v2 = vsub.f32 %v5150_v47, %v1360_v46  ;;  %v1481_v47 = vand.u32 4294901760, %v1480_v29  ;;  %v1494_v46 = vsub.f32 %v5181_v63, %v1493_v15 }
 0x10f   :  { %v1156_v6 = vmax.f32 %v4670_v5, 0.0  ;;  %v60_v5 = vsub.s32 3, %v5468_v39  ;;  %v1388_v16 = vand.u32 4294901760, %v5253_v56  ;;  %v1375_v63 = vsub.f32 %v5208_v62, %v1374_v41 }
 0x110   :  { %v1157_v48 = vmax.f32 %v4671_v58, 0.0  ;;  %v4248_v58 = vpack.c.bf16 %v1355_v19, %v1348_v22  ;;  %v1362_v61 = vand.u32 4294901760, %v1361_v2  ;;  %v1369_v19 = vand.u32 4294901760, %v1368_v26 }
 0x111   :  { %v5487_v3 = vand.u32 4294901760, %v1156_v6  ;;  %v61_v22 = vrot.slane %v5474_v43, %v60_v5  ;;  %v1382_v15 = vsub.f32 %v5213_v11, %v1381_v28  ;;  %v1488_v5 = vand.u32 4294901760, %v1487_v12 }
 0x112   :  { %v5492_v27 = vand.u32 4294901760, %v1157_v48  ;;  %v1521_v62 = vand.u32 4294901760, %v5275_v52  ;;  %v4252_v11 = vpack.c.bf16 %v1369_v19, %v1362_v61  ;;  %v1376_v28 = vand.u32 4294901760, %v1375_v63 }
 0x113   :  { %v5498_v33 = vsub.f32 %v1156_v6, %v5487_v3  ;;  %v1423_v63 = vand.u32 4294901760, %v5344_v24 }
 0x114   :  { %v5502_v50 = vsub.f32 %v1157_v48, %v5492_v27  ;;  %v1500_v48 = vand.u32 4294901760, %v5221_v18 }
 0x115   :  { %6525 = vst [vmem:[#allocation16_spill] sm:$0xff] %v5498_v33  ;;  %v6440_v38 = vand.u32 4294901760, %v5498_v33 }
 0x116   :  { %1705 = vmatprep.mubr.f32.mxu0 %v5502_v50  ;;  %v6441_v40 = vand.u32 4294901760, %v5502_v50  ;;  %v1501_v29 = vsub.f32 %v5221_v18, %v1500_v48  ;;  %v1389_v18 = vsub.f32 %v5253_v56, %v1388_v16  ;;  %v1402_v56 = vand.u32 4294901760, %v5301_v20 }
 0x117   :  { %v1336_v6 = vsub.f32 %v5498_v33, %v6440_v38  ;;  %1708 = vmatmul.mubr.f32.vlgmr.msra.gmra.mrb[2].mxu0 %v5498_v33  ;;  %v4354_v33 = vpack.c.bf16 %v1507_v51, %v1500_v48  ;;  %v1528_v48 = vand.u32 4294901760, %v5313_v21 }
 0x118   :  { %4345 = vmatpush3.bf16.msra.mxu0 %v4344_v35  ;;  %1982 = vmatprep.mubr.f32.mxu0 %v5492_v27  ;;  %v1330_v49 = vsub.f32 %v5502_v50, %v6441_v40  ;;  %v1508_v35 = vsub.f32 %v5226_v23, %v1507_v51  ;;  %v4250_v40 = vpack.c.bf16 %v1481_v47, %v1474_v4  ;;  %v1383_v4 = vand.u32 4294901760, %v1382_v15 }
 0x119   :  { %4347 = vmatprep.subr.bf16.mxu0 %v4346_v36  ;;  %v1337_v38 = vand.u32 4294901760, %v1336_v6  ;;  %v1495_v36 = vand.u32 4294901760, %v1494_v46  ;;  %v1396_v23 = vsub.f32 %v5258_v44, %v1395_v59  ;;  %v4356_v6 = vpack.c.bf16 %v1395_v59, %v1388_v16 }
 0x11a   :  { %v1331_v14 = vand.u32 4294901760, %v1330_v49  ;;  %v5528_v2 = vpop.f32.mrb[0].mxu1  ;;  %v1509_v47 = vand.u32 4294901760, %v1508_v35  ;;  %v1515_v46 = vsub.f32 %v5265_v0, %v1514_v7  ;;  %v1409_v44 = vand.u32 4294901760, %v5304_v53 }
 0x11b   :  { %v1153_v26 = vpop.f32.mrb[1].mxu1  ;;  %v4254_v12 = vpack.c.bf16 %v1495_v36, %v1488_v5  ;;  %v1390_v61 = vand.u32 4294901760, %v1389_v18  ;;  %v1397_v49 = vand.u32 4294901760, %v1396_v23  ;;  %v4256_v51 = vpack.c.bf16 %v1383_v4, %v1376_v28 }
 0x11c   :  { %4349 = vmatpush3.bf16.msra.mxu0 %v4348_v37  ;;  %1332 = vmatprep.mubr.f32.mxu1 %v1331_v14  ;;  %v4673_v41 = vadd.f32 %v1153_v26, %v61_v22  ;;  %v1502_v37 = vand.u32 4294901760, %v1501_v29  ;;  %v1403_v0 = vsub.f32 %v5301_v20, %v1402_v56  ;;  %v1529_v19 = vsub.f32 %v5313_v21, %v1528_v48 }
 0x11d   :  { %1338 = vmatmul.mubr.f32.vlgmr.msra.gmra.mrb[2].mxu1 %v1337_v38  ;;  %4351 = vmatprep.subr.bf16.mxu0 %v4350_v25  ;;  %v1522_v38 = vsub.f32 %v5275_v52, %v1521_v62  ;;  %v4358_v25 = vpack.c.bf16 %v1521_v62, %v1514_v7  ;;  %v1410_v52 = vsub.f32 %v5304_v53, %v1409_v44  ;;  %v1516_v7 = vand.u32 4294901760, %v1515_v46  ;;  %v5586_v46 = vld [vmem:[%s6402_s3 + $0x198] sm:$0xff] }
 0x11e   :  { %4249 = vmatpush3.bf16.msra.mxu1 %v4248_v58  ;;  %1568 = vmatprep.mubr.f32.mxu1 %v5492_v27  ;;  %v1159_v58 = vmax.f32 %v4673_v41, 0.0  ;;  %v4258_v22 = vpack.c.bf16 %v1509_v47, %v1502_v37  ;;  %v4360_v16 = vpack.c.bf16 %v1409_v44, %v1402_v56  ;;  %v1416_v59 = vand.u32 4294901760, %v5339_v60  ;;  %v5571_v47 = vld [vmem:[%s6402_s3 + $0x100] sm:$0xff] }
 0x11f   :  { %4251 = vmatprep.subr.bf16.mxu1 %v4250_v40  ;;  %v1535_v40 = vand.u32 4294901760, %v5318_v30  ;;  %v4260_v15 = vpack.c.bf16 %v1397_v49, %v1390_v61  ;;  %v1404_v53 = vand.u32 4294901760, %v1403_v0  ;;  %v1411_v29 = vand.u32 4294901760, %v1410_v52  ;;  %v5606_v61 = vld [vmem:[%s6402_s3 + $0x110] sm:$0xff]  ;;  %v5611_v49 = vld [vmem:[%s6402_s3 + $0x118] sm:$0xff] }
 0x120   :  { %4353 = vmatpush3.bf16.msra.mxu0 %v4352_v32  ;;  %v1523_v32 = vand.u32 4294901760, %v1522_v38  ;;  %v5547_v14 = vand.u32 4294901760, %v1159_v58  ;;  %v1417_v35 = vsub.f32 %v5339_v60, %v1416_v59  ;;  %v1424_v21 = vsub.f32 %v5344_v24, %v1423_v63  ;;  %v5557_v60 = vld [vmem:[%s6402_s3 + $0x180] sm:$0xff]  ;;  %v5562_v24 = vld [vmem:[%s6402_s3 + $0x188] sm:$0xff] }
 0x121   :  { %4355 = vmatprep.subr.bf16.mxu0 %v4354_v33  ;;  %v1536_v33 = vsub.f32 %v5318_v30, %v1535_v40  ;;  %v4362_v20 = vpack.c.bf16 %v1535_v40, %v1528_v48  ;;  %v1530_v5 = vand.u32 4294901760, %v1529_v19  ;;  %v4364_v26 = vpack.c.bf16 %v1423_v63, %v1416_v59  ;;  %v5621_v48 = vld [vmem:[%s6402_s3 + $0x1a8] sm:$0xff]  ;;  %v5657_v19 = vld [vmem:[%s6402_s3 + $0x1b0] sm:$0xff] }
 0x122   :  { %4253 = vmatpush3.bf16.msra.mxu1 %v4252_v11  ;;  %v4262_v30 = vpack.c.bf16 %v1523_v32, %v1516_v7  ;;  %v5552_v62 = vsub.f32 %v1159_v58, %v5547_v14  ;;  %v4264_v41 = vpack.c.bf16 %v1411_v29, %v1404_v53  ;;  %v1418_v11 = vand.u32 4294901760, %v1417_v35  ;;  %v5646_v7 = vld [vmem:[%s6402_s3 + $0x120] sm:$0xff]  ;;  %v5651_v32 = vld [vmem:[%s6402_s3 + $0x128] sm:$0xff]  ;;  %v5693_v53 = vld [vmem:[%s6402_s3 + $0x138] sm:$0xff] }
 0x123   :  { %4255 = vmatprep.subr.bf16.mxu1 %v4254_v12  ;;  %v1537_v36 = vand.u32 4294901760, %v1536_v33  ;;  %v1425_v18 = vand.u32 4294901760, %v1424_v21  ;;  %v6467_v4 = vand.u32 4294901760, %v5557_v60  ;;  %v6466_v37 = vand.u32 4294901760, %v5562_v24  ;;  %v5662_v33 = vld [vmem:[%s6402_s3 + $0x1b8] sm:$0xff]  ;;  %v5699_v29 = vld [vmem:[%s6402_s3 + $0x1c0] sm:$0xff] }
 0x124   :  { %4357 = vmatpush3.bf16.msra.mxu0 %v4356_v6  ;;  %6526 = vst [vmem:[#allocation17_spill] sm:$0xff] %v5552_v62  ;;  %v6445_v28 = vand.u32 4294901760, %v5552_v62  ;;  %v5576_v6 = vld [vmem:[%s6402_s3 + $0x108] sm:$0xff]  ;;  %v6465_v38 = vand.u32 4294901760, %v5571_v47  ;;  %v56_v40 = vsub.s32 2, %v5468_v39  ;;  %v6458_v0 = vand.u32 4294901760, %v5611_v49 }
 0x125   :  { %4359 = vmatprep.subr.bf16.mxu0 %v4358_v25  ;;  %v4266_v23 = vpack.c.bf16 %v1537_v36, %v1530_v5  ;;  %v4268_v12 = vpack.c.bf16 %v1425_v18, %v1418_v11  ;;  %v6464_v25 = vand.u32 4294901760, %v5576_v6  ;;  %v5599_v44 = vpack.c.bf16 %v6466_v37, %v6467_v4  ;;  %v5704_v35 = vld [vmem:[%s6402_s3 + $0x1c8] sm:$0xff] }
 0x126   :  { %4257 = vmatpush3.bf16.msra.mxu1 %v4256_v51  ;;  %v2192_v56 = vsub.f32 %v5552_v62, %v6445_v28  ;;  %v6454_v39 = vand.u32 4294901760, %v5621_v48  ;;  %v6453_v59 = vand.u32 4294901760, %v5646_v7  ;;  %v6452_v63 = vand.u32 4294901760, %v5651_v32  ;;  %v5735_v11 = vld [vmem:[%s6402_s3 + $0x148] sm:$0xff]  ;;  %v5772_v28 = vld [vmem:[%s6402_s3 + $0x150] sm:$0xff] }
 0x127   :  { %4259 = vmatprep.subr.bf16.mxu1 %v4258_v22  ;;  %v5630_v51 = vpack.c.bf16 %v6464_v25, %v6465_v38  ;;  %v6461_v22 = vand.u32 4294901760, %v5606_v61  ;;  %v6446_v5 = vand.u32 4294901760, %v5693_v53  ;;  %v6448_v36 = vand.u32 4294901760, %v5699_v29  ;;  %v6542_v38 = vld [vmem:[#allocation7_spill] sm:$0xff] }
 0x128   :  { %4361 = vmatpush3.bf16.msra.mxu0 %v4360_v16  ;;  %v2193_v52 = vand.u32 4294901760, %v2192_v56  ;;  %v57_v16 = vrot.slane %v5474_v43, %v56_v40  ;;  %v6451_v43 = vand.u32 4294901760, %v5657_v19  ;;  %v6533_v18 = vand.u32 4294901760, %v5502_v50 }
 0x129   :  { %4363 = vmatprep.subr.bf16.mxu0 %v4362_v20  ;;  %6527 = vst [vmem:[#allocation18_spill] sm:$0xff] %v5630_v51  ;;  %v5688_v20 = vld [vmem:[%s6402_s3 + $0x130] sm:$0xff]  ;;  %v6548_v25 = vand.u32 4294901760, %v5562_v24 }
 0x12a   :  { %4261 = vmatpush3.bf16.msra.mxu1 %v4260_v15  ;;  %v6450_v15 = vand.u32 4294901760, %v5662_v33  ;;  %v4672_v21 = vadd.f32 %v5528_v2, %v57_v16 }
 0x12b   :  { %4263 = vmatprep.subr.bf16.mxu1 %v4262_v30  ;;  %v6449_v30 = vand.u32 4294901760, %v5688_v20 }
 0x12c   :  { %4365 = vmatpush3.bf16.msra.mxu0 %v4364_v26  ;;  %v5723_v2 = vpack.c.bf16 %v6450_v15, %v6451_v43  ;;  %v6447_v26 = vand.u32 4294901760, %v5704_v35  ;;  %v1158_v56 = vmax.f32 %v4672_v21, 0.0  ;;  %v6469_v43 = vand.u32 4294901760, %v5772_v28 }
 0x12d   :  { %4367 = vmatprep.subr.bf16.mxu0 %v5452_v10  ;;  %v5581_v10 = vld [vmem:[%s6402_s3 + $0x190] sm:$0xff]  ;;  %v5756_v50 = vpack.c.bf16 %v6446_v5, %v6449_v30  ;;  %v5777_v5 = vld [vmem:[%s6402_s3 + $0x158] sm:$0xff] }
 0x12e   :  { %4265 = vmatpush3.bf16.msra.mxu1 %v4264_v41  ;;  %v6463_v58 = vand.u32 4294901760, %v5581_v10  ;;  %6532 = vst [vmem:[#allocation23_spill] sm:$0xff] %v5723_v2  ;;  %v5730_v41 = vld [vmem:[%s6402_s3 + $0x140] sm:$0xff]  ;;  %v5765_v16 = vpack.c.bf16 %v6447_v26, %v6448_v36  ;;  %v5788_v36 = vld [vmem:[%s6402_s3 + $0x1e8] sm:$0xff]  ;;  %v5791_v30 = vand.u32 4294901760, %v1158_v56 }
 0x12f   :  { %4267 = vmatprep.subr.bf16.mxu1 %v4266_v23  ;;  %v5743_v23 = vld [vmem:[%s6402_s3 + $0x1d0] sm:$0xff]  ;;  %6534 = vst [vmem:[#allocation24_spill] sm:$0xff] %v5756_v50  ;;  %v6457_v40 = vand.u32 4294901760, %v5730_v41  ;;  %v5783_v26 = vld [vmem:[%s6402_s3 + $0x1e0] sm:$0xff] }
 0x130   :  { %4369 = vmatpush3.bf16.msra.mxu0 %v5454_v55  ;;  %v6462_v55 = vand.u32 4294901760, %v5586_v46  ;;  %6535 = vst [vmem:[#allocation25_spill] sm:$0xff] %v5765_v16  ;;  %v6460_v21 = vand.u32 4294901760, %v5743_v23 }
 0x131   :  { %4371 = vmatprep.subr.bf16.mxu0 %v5456_v8  ;;  %v5616_v8 = vld [vmem:[%s6402_s3 + $0x1a0] sm:$0xff] }
 0x132   :  { %4269 = vmatpush3.bf16.msra.mxu1 %v4268_v12  ;;  %v5748_v12 = vld [vmem:[%s6402_s3 + $0x1d8] sm:$0xff] }
 0x133   :  { %4271 = vmatprep.subr.bf16.mxu1 %v5460_v45  ;;  %v5639_v45 = vpack.c.bf16 %v6462_v55, %v6463_v58  ;;  %v6539_v55 = vld [vmem:[#allocation6_spill] sm:$0xff] }
 0x134   :  { %4373 = vmatpush3.bf16.msra.mxu0 %v5458_v17  ;;  %v6455_v17 = vand.u32 4294901760, %v5616_v8 }
 0x135   :  { %4407 = vmatprep.subr.bf16.mxu0 %v5599_v44  ;;  %6528 = vst [vmem:[#allocation19_spill] sm:$0xff] %v5639_v45 }
 0x136   :  { %4273 = vmatpush3.bf16.msra.mxu1 %v5462_v9  ;;  %v5672_v9 = vpack.c.bf16 %v6458_v0, %v6461_v22  ;;  %v6538_v0 = vld [vmem:[#allocation5_spill] sm:$0xff]  ;;  %v5833_v22 = vsub.f32 %v1158_v56, %v5791_v30 }
 0x137   :  { %1984 = vmatmul.mubr.f32.vlgmr.msra.gmra.mrb[4].mxu0 %v5487_v3  ;;  %4275 = vmatprep.subr.bf16.mxu1 %v5464_v54  ;;  %v5681_v54 = vpack.c.bf16 %v6454_v39, %v6455_v17  ;;  %v6471_v39 = vand.u32 4294901760, %v5783_v26  ;;  %v6470_v17 = vand.u32 4294901760, %v5788_v36 }
 0x138   :  { %4409 = vmatpush3.bf16.msra.mxu0 %v5630_v51  ;;  %6529 = vst [vmem:[#allocation20_spill] sm:$0xff] %v5672_v9  ;;  %2194 = vmatprep.mubr.f32.mxu0 %v2193_v52  ;;  %v6456_v52 = vand.u32 4294901760, %v5735_v11 }
 0x139   :  { %4411 = vmatprep.subr.bf16.mxu0 %v5639_v45  ;;  %6530 = vst [vmem:[#allocation21_spill] sm:$0xff] %v5681_v54  ;;  %v5850_v56 = vpack.c.bf16 %v6470_v17, %v6471_v39  ;;  %v6543_v17 = vld [vmem:[#allocation8_spill] sm:$0xff] }
 0x13a   :  { %4277 = vmatpush3.bf16.msra.mxu1 %v5466_v57  ;;  %v5713_v57 = vpack.c.bf16 %v6452_v63, %v6453_v59  ;;  %v5798_v15 = vpack.c.bf16 %v6456_v52, %v6457_v40  ;;  %v6468_v63 = vand.u32 4294901760, %v5777_v5  ;;  %v5814_v52 = vld [vmem:[%s6402_s3 + $0x160] sm:$0xff]  ;;  %v5819_v40 = vld [vmem:[%s6402_s3 + $0x168] sm:$0xff] }
 0x13b   :  { %4311 = vmatprep.subr.bf16.mxu1 %v5296_v13  ;;  %6541 = vst [vmem:[#allocation6_spill] sm:$0xff] %v5850_v56  ;;  %v6544_v39 = vand.u32 4294901760, %v5814_v52  ;;  %v6545_v4 = vand.u32 4294901760, %v5819_v40 }
 0x13c   :  { %4413 = vmatpush3.bf16.msra.mxu0 %v5672_v9  ;;  %6531 = vst [vmem:[#allocation22_spill] sm:$0xff] %v5713_v57  ;;  %6536 = vst [vmem:[#allocation26_spill] sm:$0xff] %v5798_v15  ;;  %v5841_v58 = vpack.c.bf16 %v6468_v63, %v6469_v43  ;;  %v5857_v63 = vld [vmem:[%s6402_s3 + $0x170] sm:$0xff]  ;;  %v5862_v43 = vld [vmem:[%s6402_s3 + $0x178] sm:$0xff] }
 0x13d   :  { %1570 = vmatmul.mubr.f32.vlgmr.msra.gmra.mrb[4].mxu1 %v5487_v3  ;;  %4415 = vmatprep.subr.bf16.mxu0 %v5681_v54  ;;  %v5872_v37 = vpack.c.bf16 %v6545_v4, %v6544_v39 }
 0x13e   :  { %4313 = vmatpush3.bf16.msra.mxu1 %v5325_v31  ;;  %1812 = vmatprep.mubr.f32.mxu1 %v6533_v18  ;;  %v6459_v18 = vand.u32 4294901760, %v5748_v12  ;;  %6540 = vst [vmem:[#allocation5_spill] sm:$0xff] %v5841_v58 }
 0x13f   :  { %4315 = vmatprep.subr.bf16.mxu1 %v5332_v1  ;;  %6546 = vst [vmem:[#allocation7_spill] sm:$0xff] %v5872_v37 }
 0x140   :  { %4417 = vmatpush3.bf16.msra.mxu0 %v5713_v57  ;;  %v5807_v59 = vpack.c.bf16 %v6459_v18, %v6460_v21  ;;  %v5825_v18 = vld [vmem:[%s6402_s3 + $0x1f0] sm:$0xff]  ;;  %v5830_v21 = vld [vmem:[%s6402_s3 + $0x1f8] sm:$0xff]  ;;  %v6555_v57 = vand.u32 4294901760, %v5571_v47 }
 0x141   :  { %4419 = vmatprep.subr.bf16.mxu0 %v5723_v2  ;;  %v5884_v2 = vsub.f32 %v5562_v24, %v6548_v25  ;;  %v6550_v4 = vand.u32 4294901760, %v5830_v21  ;;  %v6556_v25 = vand.u32 4294901760, %v5576_v6 }
 0x142   :  { %4317 = vmatpush3.bf16.msra.mxu1 %v5354_v34  ;;  %6537 = vst [vmem:[#allocation27_spill] sm:$0xff] %v5807_v59  ;;  %v5901_v24 = vsub.f32 %v5571_v47, %v6555_v57  ;;  %v6561_v47 = vand.u32 4294901760, %v5586_v46 }
 0x143   :  { %4319 = vmatprep.subr.bf16.mxu1 %v5361_v42 }
 0x144   :  { %4421 = vmatpush3.bf16.msra.mxu0 %v5756_v50  ;;  %v5923_v57 = vsub.f32 %v5586_v46, %v6561_v47 }
 0x145   :  { %4423 = vmatprep.subr.bf16.mxu0 %v5765_v16  ;;  %v6547_v16 = vand.u32 4294901760, %v5557_v60 }
 0x146   :  { %4321 = vmatpush3.bf16.msra.mxu1 %v6538_v0 }
 0x147   :  { %4323 = vmatprep.subr.bf16.mxu1 %v6539_v55  ;;  %v5879_v50 = vsub.f32 %v5557_v60, %v6547_v16  ;;  %v6554_v16 = vld [vmem:[#allocation10_spill] sm:$0xff] }
 0x148   :  { %4425 = vmatpush3.bf16.msra.mxu0 %v5798_v15  ;;  %v6553_v15 = vand.u32 4294901760, %v5833_v22 }
 0x149   :  { %4427 = vmatprep.subr.bf16.mxu0 %v5807_v59  ;;  %v6552_v59 = vld [vmem:[#allocation9_spill] sm:$0xff] }
 0x14a   :  { %4325 = vmatpush3.bf16.msra.mxu1 %v6542_v38  ;;  %v2198_v60 = vsub.f32 %v5833_v22, %v6553_v15  ;;  %v6560_v15 = vand.u32 4294901760, %v5581_v10 }
 0x14b   :  { %4327 = vmatprep.subr.bf16.mxu1 %v6543_v17 }
 0x14c   :  { %4429 = vmatpush3.bf16.msra.mxu0 %v5841_v58  ;;  %v6549_v58 = vand.u32 4294901760, %v5825_v18  ;;  %v5918_v9 = vsub.f32 %v5581_v10, %v6560_v15  ;;  %v6565_v15 = vand.u32 4294901760, %v5611_v49 }
 0x14d   :  { %4431 = vmatprep.subr.bf16.mxu0 %v5850_v56  ;;  %v5906_v56 = vsub.f32 %v5576_v6, %v6556_v25  ;;  %v4470_v6 = vpack.c.bf16 %v5884_v2, %v5879_v50  ;;  %v6562_v25 = vld [vmem:[#allocation11_spill] sm:$0xff] }
 0x14e   :  { %v5891_v39 = vpack.c.bf16 %v6550_v4, %v6549_v58  ;;  %4329 = vmatpush3.bf16.msra.mxu1 %v6552_v59  ;;  %v6557_v58 = vand.u32 4294901760, %v5857_v63  ;;  %v6558_v4 = vand.u32 4294901760, %v5862_v43  ;;  %v5938_v46 = vsub.f32 %v5611_v49, %v6565_v15  ;;  %v6569_v15 = vld [vmem:[#allocation14_spill] sm:$0xff] }
 0x14f   :  { %4331 = vmatprep.subr.bf16.mxu1 %v6554_v16  ;;  %v4472_v47 = vpack.c.bf16 %v5906_v56, %v5901_v24  ;;  %v4474_v49 = vpack.c.bf16 %v5923_v57, %v5918_v9 }
 0x150   :  { %6551 = vst [vmem:[#allocation8_spill] sm:$0xff] %v5891_v39  ;;  %4433 = vmatpush3.bf16.msra.mxu0 %v5872_v37  ;;  %v5913_v54 = vpack.c.bf16 %v6558_v4, %v6557_v58  ;;  %v6563_v37 = vld [vmem:[#allocation12_spill] sm:$0xff]  ;;  %v2199_v58 = vand.u32 4294901760, %v2198_v60  ;;  %v6564_v4 = vand.u32 4294901760, %v5606_v61  ;;  %v6567_v60 = vand.u32 4294901760, %v5621_v48 }
 0x151   :  { %4435 = vmatprep.subr.bf16.mxu0 %v5891_v39  ;;  %v6566_v39 = vand.u32 4294901760, %v5616_v8 }
 0x152   :  { %6559 = vst [vmem:[#allocation9_spill] sm:$0xff] %v5913_v54  ;;  %4333 = vmatpush3.bf16.msra.mxu1 %v6562_v25  ;;  %v5933_v10 = vsub.f32 %v5606_v61, %v6564_v4  ;;  %v5951_v61 = vsub.f32 %v5621_v48, %v6567_v60  ;;  %v6568_v4 = vld [vmem:[#allocation13_spill] sm:$0xff]  ;;  %v6573_v60 = vand.u32 4294901760, %v5662_v33 }
 0x153   :  { %4335 = vmatprep.subr.bf16.mxu1 %v6563_v37  ;;  %v5946_v45 = vsub.f32 %v5616_v8, %v6566_v39  ;;  %v6571_v8 = vand.u32 4294901760, %v5651_v32 }
 0x154   :  { %4437 = vmatpush3.bf16.msra.mxu0 %v5913_v54  ;;  %v6570_v54 = vand.u32 4294901760, %v5646_v7  ;;  %v4476_v48 = vpack.c.bf16 %v5938_v46, %v5933_v10 }
 0x155   :  { %4471 = vmatprep.subr.bf16.mxu0 %v4470_v6  ;;  %v5965_v39 = vsub.f32 %v5651_v32, %v6571_v8  ;;  %v6572_v6 = vand.u32 4294901760, %v5657_v19  ;;  %v4478_v32 = vpack.c.bf16 %v5951_v61, %v5946_v45 }
 0x156   :  { %4337 = vmatpush3.bf16.msra.mxu1 %v6568_v4  ;;  %v5960_v51 = vsub.f32 %v5646_v7, %v6570_v54  ;;  %v5978_v7 = vsub.f32 %v5662_v33, %v6573_v60  ;;  %v6574_v54 = vld [vmem:[#allocation15_spill] sm:$0xff] }
 0x157   :  { %2200 = vmatmul.mubr.f32.vlgmr.msra.gmra.mrb[6].mxu0 %v2199_v58  ;;  %4339 = vmatprep.subr.bf16.mxu1 %v6569_v15  ;;  %v5973_v58 = vsub.f32 %v5657_v19, %v6572_v6  ;;  %v6576_v19 = vand.u32 4294901760, %v5693_v53 }
 0x158   :  { %4473 = vmatpush3.bf16.msra.mxu0 %v4472_v47  ;;  %2567 = vmatprep.mubr.f32.mxu0 %v5552_v62  ;;  %v6575_v47 = vand.u32 4294901760, %v5688_v20  ;;  %v4480_v33 = vpack.c.bf16 %v5965_v39, %v5960_v51 }
 0x159   :  { %4475 = vmatprep.subr.bf16.mxu0 %v4474_v49  ;;  %v5992_v6 = vsub.f32 %v5693_v53, %v6576_v19  ;;  %v6577_v49 = vand.u32 4294901760, %v5699_v29  ;;  %v4482_v53 = vpack.c.bf16 %v5978_v7, %v5973_v58 }
 0x15a   :  { %4341 = vmatpush3.bf16.msra.mxu1 %v6574_v54  ;;  %v5987_v8 = vsub.f32 %v5688_v20, %v6575_v47  ;;  %v6579_v20 = vld [vmem:[#allocation16_spill] sm:$0xff] }
 0x15b   :  { %4375 = vmatprep.subr.bf16.mxu1 %v5296_v13  ;;  %v5999_v60 = vsub.f32 %v5699_v29, %v6577_v49  ;;  %v6578_v13 = vand.u32 4294901760, %v5704_v35  ;;  %v6580_v47 = vand.u32 4294901760, %v6579_v20  ;;  %v6581_v29 = vand.u32 4294901760, %v5730_v41 }
 0x15c   :  { %4477 = vmatpush3.bf16.msra.mxu0 %v4476_v48  ;;  %v6587_v20 = vand.u32 4294901760, %v5783_v26 }
 0x15d   :  { %v6004_v62 = vsub.f32 %v5704_v35, %v6578_v13  ;;  %1816 = vmatmul.mubr.f32.vlgmr.msra.gmra.mrb[6].mxu1 %v6580_v47  ;;  %4479 = vmatprep.subr.bf16.mxu0 %v4478_v32  ;;  %v6016_v48 = vsub.f32 %v5730_v41, %v6581_v29  ;;  %v6582_v35 = vand.u32 4294901760, %v5735_v11  ;;  %v4484_v32 = vpack.c.bf16 %v5992_v6, %v5987_v8 }
 0x15e   :  { %4377 = vmatpush3.bf16.msra.mxu1 %v5325_v31  ;;  %2086 = vmatprep.mubr.f32.mxu1 %v5492_v27  ;;  %v6583_v31 = vand.u32 4294901760, %v5743_v23 }
 0x15f   :  { %4379 = vmatprep.subr.bf16.mxu1 %v5332_v1  ;;  %v6021_v19 = vsub.f32 %v5735_v11, %v6582_v35  ;;  %v6584_v1 = vand.u32 4294901760, %v5748_v12  ;;  %v4486_v41 = vpack.c.bf16 %v6004_v62, %v5999_v60  ;;  %v6585_v11 = vand.u32 4294901760, %v5772_v28 }
 0x160   :  { %4481 = vmatpush3.bf16.msra.mxu0 %v4480_v33  ;;  %v6028_v27 = vsub.f32 %v5743_v23, %v6583_v31  ;;  %v6586_v23 = vand.u32 4294901760, %v5777_v5  ;;  %v6591_v35 = vand.u32 4294901760, %v5825_v18 }
 0x161   :  { %v6033_v49 = vsub.f32 %v5748_v12, %v6584_v1  ;;  %4483 = vmatprep.subr.bf16.mxu0 %v4482_v53  ;;  %v6042_v33 = vsub.f32 %v5772_v28, %v6585_v11  ;;  %v4488_v12 = vpack.c.bf16 %v6021_v19, %v6016_v48  ;;  %v2215_v11 = vand.u32 4294901760, %v5906_v56 }
 0x162   :  { %4381 = vmatpush3.bf16.msra.mxu1 %v5354_v34  ;;  %v6047_v13 = vsub.f32 %v5777_v5, %v6586_v23  ;;  %v6054_v34 = vsub.f32 %v5783_v26, %v6587_v20  ;;  %v6589_v5 = vand.u32 4294901760, %v5814_v52  ;;  %v6590_v26 = vand.u32 4294901760, %v5819_v40 }
 0x163   :  { %4383 = vmatprep.subr.bf16.mxu1 %v5361_v42  ;;  %v6588_v42 = vand.u32 4294901760, %v5788_v36  ;;  %v4490_v28 = vpack.c.bf16 %v6033_v49, %v6028_v27 }
 0x164   :  { %4485 = vmatpush3.bf16.msra.mxu0 %v4484_v32  ;;  %v6068_v53 = vsub.f32 %v5814_v52, %v6589_v5  ;;  %v6073_v29 = vsub.f32 %v5819_v40, %v6590_v26  ;;  %v6593_v40 = vand.u32 4294901760, %v5857_v63  ;;  %v2341_v5 = vand.u32 4294901760, %v5923_v57 }
 0x165   :  { %v6059_v47 = vsub.f32 %v5788_v36, %v6588_v42  ;;  %4487 = vmatprep.subr.bf16.mxu0 %v4486_v41  ;;  %v4492_v36 = vpack.c.bf16 %v6047_v13, %v6042_v33  ;;  %v2320_v41 = vand.u32 4294901760, %v5879_v50  ;;  %v2216_v42 = vsub.f32 %v5906_v56, %v2215_v11 }
 0x166   :  { %4385 = vmatpush3.bf16.msra.mxu1 %v6538_v0  ;;  %v6080_v0 = vsub.f32 %v5825_v18, %v6591_v35  ;;  %v6093_v31 = vsub.f32 %v5857_v63, %v6593_v40  ;;  %v6594_v18 = vand.u32 4294901760, %v5862_v43  ;;  %v2342_v56 = vsub.f32 %v5923_v57, %v2341_v5 }
 0x167   :  { %4387 = vmatprep.subr.bf16.mxu1 %v6539_v55  ;;  %v6592_v55 = vand.u32 4294901760, %v5830_v21  ;;  %v4494_v52 = vpack.c.bf16 %v6059_v47, %v6054_v34 }
 0x168   :  { %4489 = vmatpush3.bf16.msra.mxu0 %v4488_v12  ;;  %v6099_v1 = vsub.f32 %v5862_v43, %v6594_v18  ;;  %v2321_v43 = vsub.f32 %v5879_v50, %v2320_v41  ;;  %v2229_v50 = vand.u32 4294901760, %v5938_v46 }
 0x169   :  { %v6085_v32 = vsub.f32 %v5830_v21, %v6592_v55  ;;  %4491 = vmatprep.subr.bf16.mxu0 %v4490_v28  ;;  %v4496_v21 = vpack.c.bf16 %v6073_v29, %v6068_v53  ;;  %v2334_v28 = vand.u32 4294901760, %v5918_v9  ;;  %v2217_v55 = vand.u32 4294901760, %v2216_v42 }
 0x16a   :  { %4389 = vmatpush3.bf16.msra.mxu1 %v6542_v38  ;;  %v2327_v38 = vand.u32 4294901760, %v5884_v2  ;;  %v4500_v12 = vpack.c.bf16 %v6099_v1, %v6093_v31 }
 0x16b   :  { %4391 = vmatprep.subr.bf16.mxu1 %v6543_v17  ;;  %v4498_v63 = vpack.c.bf16 %v6085_v32, %v6080_v0  ;;  %v2208_v17 = vand.u32 4294901760, %v5901_v24  ;;  %v4538_v40 = vpack.c.bf16 %v2341_v5, %v2334_v28 }
 0x16c   :  { %4493 = vmatpush3.bf16.msra.mxu0 %v4492_v36  ;;  %v2328_v23 = vsub.f32 %v5884_v2, %v2327_v38  ;;  %v2222_v2 = vand.u32 4294901760, %v5933_v10 }
 0x16d   :  { %4495 = vmatprep.subr.bf16.mxu0 %v4494_v52  ;;  %v2209_v20 = vsub.f32 %v5901_v24, %v2208_v17  ;;  %v4536_v36 = vpack.c.bf16 %v2215_v11, %v2208_v17  ;;  %v2335_v24 = vsub.f32 %v5918_v9, %v2334_v28  ;;  %v2348_v52 = vand.u32 4294901760, %v5946_v45 }
 0x16e   :  { %4393 = vmatpush3.bf16.msra.mxu1 %v6552_v59  ;;  %v4534_v59 = vpack.c.bf16 %v2327_v38, %v2320_v41  ;;  %v2329_v26 = vand.u32 4294901760, %v2328_v23  ;;  %v2223_v18 = vsub.f32 %v5933_v10, %v2222_v2  ;;  %v2236_v38 = vand.u32 4294901760, %v5960_v51 }
 0x16f   :  { %4395 = vmatprep.subr.bf16.mxu1 %v6554_v16  ;;  %v2322_v16 = vand.u32 4294901760, %v2321_v43  ;;  %v2210_v35 = vand.u32 4294901760, %v2209_v20  ;;  %v2349_v9 = vsub.f32 %v5946_v45, %v2348_v52  ;;  %v2336_v17 = vand.u32 4294901760, %v2335_v24 }
 0x170   :  { %4497 = vmatpush3.bf16.msra.mxu0 %v4496_v21  ;;  %v2230_v21 = vsub.f32 %v5938_v46, %v2229_v50  ;;  %v2343_v10 = vand.u32 4294901760, %v2342_v56  ;;  %v2362_v11 = vand.u32 4294901760, %v5973_v58  ;;  %v2369_v45 = vand.u32 4294901760, %v5978_v7 }
 0x171   :  { %4499 = vmatprep.subr.bf16.mxu0 %v4498_v63  ;;  %v4438_v41 = vpack.c.bf16 %v2329_v26, %v2322_v16  ;;  %v2243_v63 = vand.u32 4294901760, %v5965_v39  ;;  %v4440_v46 = vpack.c.bf16 %v2217_v55, %v2210_v35  ;;  %v2257_v20 = vand.u32 4294901760, %v5992_v6 }
 0x172   :  { %4397 = vmatpush3.bf16.msra.mxu1 %v6562_v25  ;;  %v2355_v25 = vand.u32 4294901760, %v5951_v61  ;;  %v2231_v43 = vand.u32 4294901760, %v2230_v21  ;;  %v2350_v42 = vand.u32 4294901760, %v2349_v9  ;;  %v4442_v28 = vpack.c.bf16 %v2343_v10, %v2336_v17 }
 0x173   :  { %4399 = vmatprep.subr.bf16.mxu1 %v6563_v37  ;;  %v4540_v37 = vpack.c.bf16 %v2229_v50, %v2222_v2  ;;  %v2244_v23 = vsub.f32 %v5965_v39, %v2243_v63  ;;  %v2363_v5 = vsub.f32 %v5973_v58, %v2362_v11  ;;  %v2370_v2 = vsub.f32 %v5978_v7, %v2369_v45 }
 0x174   :  { %4501 = vmatpush3.bf16.msra.mxu0 %v4500_v12  ;;  %v2356_v57 = vsub.f32 %v5951_v61, %v2355_v25  ;;  %v2224_v61 = vand.u32 4294901760, %v2223_v18  ;;  %v2250_v12 = vand.u32 4294901760, %v5987_v8  ;;  %v4544_v50 = vpack.c.bf16 %v2243_v63, %v2236_v38 }
 0x175   :  { %4535 = vmatprep.subr.bf16.mxu0 %v4534_v59  ;;  %v4546_v16 = vpack.c.bf16 %v2369_v45, %v2362_v11  ;;  %v2383_v39 = vand.u32 4294901760, %v6004_v62  ;;  %v2245_v26 = vand.u32 4294901760, %v2244_v23  ;;  %v2258_v24 = vsub.f32 %v5992_v6, %v2257_v20 }
 0x176   :  { %4401 = vmatpush3.bf16.msra.mxu1 %v6568_v4  ;;  %v4542_v4 = vpack.c.bf16 %v2355_v25, %v2348_v52  ;;  %v2357_v59 = vand.u32 4294901760, %v2356_v57  ;;  %v4444_v58 = vpack.c.bf16 %v2231_v43, %v2224_v61  ;;  %v4548_v7 = vpack.c.bf16 %v2257_v20, %v2250_v12 }
 0x177   :  { %2570 = vmatmul.mubr.f32.vlgmr.msra.gmra.mrb[8].mxu0 %v5833_v22  ;;  %4403 = vmatprep.subr.bf16.mxu1 %v6569_v15  ;;  %v2237_v15 = vsub.f32 %v5960_v51, %v2236_v38  ;;  %v2376_v51 = vand.u32 4294901760, %v5999_v60  ;;  %v2264_v35 = vand.u32 4294901760, %v6016_v48  ;;  %v2364_v55 = vand.u32 4294901760, %v2363_v5 }
 0x178   :  { %4537 = vmatpush3.bf16.msra.mxu0 %v4536_v36  ;;  %2844 = vmatprep.mubr.f32.mxu0 %v5547_v14  ;;  %v2251_v36 = vsub.f32 %v5987_v8, %v2250_v12  ;;  %v4446_v56 = vpack.c.bf16 %v2357_v59, %v2350_v42  ;;  %v2371_v52 = vand.u32 4294901760, %v2370_v2  ;;  %v2384_v25 = vsub.f32 %v6004_v62, %v2383_v39 }
 0x179   :  { %4539 = vmatprep.subr.bf16.mxu0 %v4538_v40  ;;  %v4550_v40 = vpack.c.bf16 %v2383_v39, %v2376_v51  ;;  %v2271_v8 = vand.u32 4294901760, %v6021_v19  ;;  %v2390_v6 = vand.u32 4294901760, %v6028_v27  ;;  %v2397_v18 = vand.u32 4294901760, %v6033_v49 }
 0x17a   :  { %4405 = vmatpush3.bf16.msra.mxu1 %v6574_v54  ;;  %v2238_v54 = vand.u32 4294901760, %v2237_v15  ;;  %v2278_v9 = vand.u32 4294901760, %v6042_v33  ;;  %v2265_v57 = vsub.f32 %v6016_v48, %v2264_v35  ;;  %v4450_v63 = vpack.c.bf16 %v2371_v52, %v2364_v55 }
 0x17b   :  { %4439 = vmatprep.subr.bf16.mxu1 %v4438_v41  ;;  %v2259_v41 = vand.u32 4294901760, %v2258_v24  ;;  %v2391_v62 = vsub.f32 %v6028_v27, %v2390_v6  ;;  %v2398_v38 = vsub.f32 %v6033_v49, %v2397_v18  ;;  %v2285_v17 = vand.u32 4294901760, %v6047_v13 }
 0x17c   :  { %4541 = vmatpush3.bf16.msra.mxu0 %v4540_v37  ;;  %v4448_v21 = vpack.c.bf16 %v2245_v26, %v2238_v54  ;;  %v2252_v37 = vand.u32 4294901760, %v2251_v36  ;;  %v2404_v11 = vand.u32 4294901760, %v6054_v34  ;;  %v2411_v45 = vand.u32 4294901760, %v6059_v47 }
 0x17d   :  { %2088 = vmatmul.mubr.f32.vlgmr.msra.gmra.mrb[8].mxu1 %v5487_v3  ;;  %4543 = vmatprep.subr.bf16.mxu0 %v4542_v4  ;;  %v2377_v3 = vsub.f32 %v5999_v60, %v2376_v51  ;;  %v2272_v60 = vsub.f32 %v6021_v19, %v2271_v8  ;;  %v4552_v4 = vpack.c.bf16 %v2271_v8, %v2264_v35  ;;  %v2266_v49 = vand.u32 4294901760, %v2265_v57  ;;  %v6599_v57 = vld [vmem:[#allocation20_spill] sm:$0xff] }
 0x17e   :  { %4441 = vmatpush3.bf16.msra.mxu1 %v4440_v46  ;;  %2430 = vmatprep.mubr.f32.mxu1 %v5547_v14  ;;  %v2385_v46 = vand.u32 4294901760, %v2384_v25  ;;  %v4452_v48 = vpack.c.bf16 %v2259_v41, %v2252_v37  ;;  %v4554_v61 = vpack.c.bf16 %v2397_v18, %v2390_v6  ;;  %v2279_v19 = vsub.f32 %v6042_v33, %v2278_v9 }
 0x17f   :  { %4443 = vmatprep.subr.bf16.mxu1 %v4442_v28  ;;  %v2378_v10 = vand.u32 4294901760, %v2377_v3  ;;  %v2286_v27 = vsub.f32 %v6047_v13, %v2285_v17  ;;  %v2273_v43 = vand.u32 4294901760, %v2272_v60  ;;  %v2392_v15 = vand.u32 4294901760, %v2391_v62  ;;  %v6600_v60 = vld [vmem:[#allocation21_spill] sm:$0xff]  ;;  %v6601_v62 = vld [vmem:[#allocation22_spill] sm:$0xff] }
 0x180   :  { %4545 = vmatpush3.bf16.msra.mxu0 %v4544_v50  ;;  %v2399_v23 = vand.u32 4294901760, %v2398_v38  ;;  %v2405_v20 = vsub.f32 %v6054_v34, %v2404_v11  ;;  %v2412_v42 = vsub.f32 %v6059_v47, %v2411_v45  ;;  %v4556_v59 = vpack.c.bf16 %v2285_v17, %v2278_v9  ;;  %v6598_v9 = vld [vmem:[#allocation19_spill] sm:$0xff]  ;;  %v6604_v17 = vld [vmem:[#allocation25_spill] sm:$0xff] }
 0x181   :  { %4547 = vmatprep.subr.bf16.mxu0 %v4546_v16  ;;  %v4454_v12 = vpack.c.bf16 %v2385_v46, %v2378_v10  ;;  %v4558_v28 = vpack.c.bf16 %v2411_v45, %v2404_v11  ;;  %v2292_v5 = vand.u32 4294901760, %v6068_v53  ;;  %v2299_v33 = vand.u32 4294901760, %v6073_v29  ;;  %v6602_v38 = vld [vmem:[#allocation23_spill] sm:$0xff]  ;;  %v6605_v10 = vld [vmem:[#allocation26_spill] sm:$0xff] }
 0x182   :  { %4445 = vmatpush3.bf16.msra.mxu1 %v4444_v58  ;;  %v2280_v13 = vand.u32 4294901760, %v2279_v19  ;;  %v2287_v2 = vand.u32 4294901760, %v2286_v27  ;;  %v2418_v50 = vand.u32 4294901760, %v6080_v0  ;;  %v2425_v16 = vand.u32 4294901760, %v6085_v32  ;;  %v6606_v46 = vld [vmem:[#allocation27_spill] sm:$0xff]  ;;  %v6608_v11 = vld [vmem:[#allocation6_spill] sm:$0xff] }
 0x183   :  { %4447 = vmatprep.subr.bf16.mxu1 %v4446_v56  ;;  %v4456_v51 = vpack.c.bf16 %v2273_v43, %v2266_v49  ;;  %v4458_v39 = vpack.c.bf16 %v2399_v23, %v2392_v15  ;;  %v2293_v34 = vsub.f32 %v6068_v53, %v2292_v5  ;;  %v2300_v47 = vsub.f32 %v6073_v29, %v2299_v33  ;;  %v6609_v45 = vld [vmem:[#allocation7_spill] sm:$0xff] }
 0x184   :  { %4549 = vmatpush3.bf16.msra.mxu0 %v4548_v7  ;;  %v2406_v54 = vand.u32 4294901760, %v2405_v20  ;;  %v2413_v26 = vand.u32 4294901760, %v2412_v42  ;;  %v2419_v36 = vsub.f32 %v6080_v0, %v2418_v50  ;;  %v2426_v24 = vsub.f32 %v6085_v32, %v2425_v16  ;;  %v3528_v20 = vld [vmem:[%s6403_s4] ss:$0 sm:$0xff] }
 0x185   :  { %4551 = vmatprep.subr.bf16.mxu0 %v4550_v40  ;;  %v4560_v58 = vpack.c.bf16 %v2299_v33, %v2292_v5  ;;  %v2306_v7 = vand.u32 4294901760, %v6093_v31  ;;  %v2313_v56 = vand.u32 4294901760, %v6099_v1  ;;  %v4460_v35 = vpack.c.bf16 %v2287_v2, %v2280_v13  ;;  %v6235_v13 = vld [vmem:[%s6404_s5 + $0x8] sm:$0xff]  ;;  %v6240_v2 = vld [vmem:[%s6404_s5 + $0x10] sm:$0xff] }
 0x186   :  { %4449 = vmatpush3.bf16.msra.mxu1 %v4448_v21  ;;  %v4562_v55 = vpack.c.bf16 %v2425_v16, %v2418_v50  ;;  %v2294_v53 = vand.u32 4294901760, %v2293_v34  ;;  %v2301_v52 = vand.u32 4294901760, %v2300_v47  ;;  %v4462_v0 = vpack.c.bf16 %v2413_v26, %v2406_v54 }
 0x187   :  { %4451 = vmatprep.subr.bf16.mxu1 %v4450_v63  ;;  %v2307_v29 = vsub.f32 %v6093_v31, %v2306_v7  ;;  %v2314_v3 = vsub.f32 %v6099_v1, %v2313_v56  ;;  %v2420_v25 = vand.u32 4294901760, %v2419_v36  ;;  %v2427_v32 = vand.u32 4294901760, %v2426_v24  ;;  %v6595_v31 = vld [vmem:[#allocation18_spill] sm:$0xff]  ;;  %v6596_v1 = vld [vmem:[#allocation17_spill] sm:$0xff]  ;;  %v6603_v63 = vld [vmem:[#allocation24_spill] sm:$0xff] }
 0x188   :  { %4553 = vmatpush3.bf16.msra.mxu0 %v4552_v4  ;;  %v4564_v40 = vpack.c.bf16 %v2313_v56, %v2306_v7  ;;  %v4464_v8 = vpack.c.bf16 %v2301_v52, %v2294_v53  ;;  %v6597_v41 = vand.u32 4294901760, %v6596_v1  ;;  %v6607_v4 = vld [vmem:[#allocation5_spill] sm:$0xff]  ;;  %v6612_v19 = vand.u32 4294901760, %v5833_v22 }
 0x189   :  { %4555 = vmatprep.subr.bf16.mxu0 %v4554_v61  ;;  %v2308_v6 = vand.u32 4294901760, %v2307_v29  ;;  %v2315_v18 = vand.u32 4294901760, %v2314_v3  ;;  %v4466_v21 = vpack.c.bf16 %v2427_v32, %v2420_v25  ;;  %v6611_v61 = vld [vmem:[#allocation9_spill] sm:$0xff]  ;;  %v4733_v50 = vmov 0.0|0.0  }
 0x18a   :  { %4453 = vmatpush3.bf16.msra.mxu1 %v4452_v48  ;;  %v6610_v48 = vld [vmem:[#allocation8_spill] sm:$0xff]  ;;  %v2982_v34 = vand.u32 4294901760, %v6240_v2 }
 0x18b   :  { %4455 = vmatprep.subr.bf16.mxu1 %v4454_v12  ;;  %v4468_v37 = vpack.c.bf16 %v2315_v18, %v2308_v6  ;;  %v2960_v18 = vld [vmem:[%s6404_s5 + $0x20] sm:$0xff] }
 0x18c   :  { %4557 = vmatpush3.bf16.msra.mxu0 %v4556_v59  ;;  %v6262_v24 = vsub.f32 %v6240_v2, %v2982_v34 }
 0x18d   :  { %4559 = vmatprep.subr.bf16.mxu0 %v4558_v28 }
 0x18e   :  { %4457 = vmatpush3.bf16.msra.mxu1 %v4456_v51  ;;  %v2979_v51 = vand.u32 4294901760, %v6235_v13 }
 0x18f   :  { %4459 = vmatprep.subr.bf16.mxu1 %v4458_v39  ;;  %v6248_v39 = vld [vmem:[%s6404_s5 + $0x18] sm:$0xff] }
 0x190   :  { %4561 = vmatpush3.bf16.msra.mxu0 %v4560_v58  ;;  %v2985_v54 = vand.u32 4294901760, %v6248_v39  ;;  %v6257_v36 = vsub.f32 %v6235_v13, %v2979_v51 }
 0x191   :  { %4563 = vmatprep.subr.bf16.mxu0 %v4562_v55 }
 0x192   :  { %4461 = vmatpush3.bf16.msra.mxu1 %v4460_v35  ;;  %v6265_v58 = vsub.f32 %v6248_v39, %v2985_v54  ;;  %v3068_v56 = vand.u32 4294901760, %v6257_v36  ;;  %v3075_v35 = vand.u32 4294901760, %v6262_v24 }
 0x193   :  { %4463 = vmatprep.subr.bf16.mxu1 %v4462_v0 }
 0x194   :  { %4565 = vmatpush3.bf16.msra.mxu0 %v4564_v40  ;;  %v3082_v55 = vand.u32 4294901760, %v6265_v58  ;;  %v3069_v52 = vsub.f32 %v6257_v36, %v3068_v56  ;;  %v3076_v29 = vsub.f32 %v6262_v24, %v3075_v35  ;;  %v4626_v2 = vpack.c.bf16 %v6265_v58, %v6262_v24 }
 0x195   :  { %4610 = vmatprep.subr.bf16.mxu0 %v4733_v50 }
 0x196   :  { %4465 = vmatpush3.bf16.msra.mxu1 %v4464_v8  ;;  %v3083_v3 = vsub.f32 %v6265_v58, %v3082_v55  ;;  %v3070_v25 = vand.u32 4294901760, %v3069_v52  ;;  %v3077_v32 = vand.u32 4294901760, %v3076_v29 }
 0x197   :  { %2846 = vmatmul.mubr.f32.vlgmr.msra.gmra.mrb[10].mxu0 %v5791_v30  ;;  %4467 = vmatprep.subr.bf16.mxu1 %v4466_v21  ;;  %v2961_v21 = vld [vmem:[%s6404_s5 + $0x28] sm:$0xff] }
 0x198   :  { %v3084_v40 = vand.u32 4294901760, %v3083_v3 }
 0x19a   :  { %4469 = vmatpush3.bf16.msra.mxu1 %v4468_v37  ;;  %v4614_v6 = vpack.c.bf16 %v3084_v40, %v3077_v32  ;;  %v2988_v37 = vand.u32 4294901760, %v2960_v18 }
 0x19b   :  { %4503 = vmatprep.subr.bf16.mxu1 %v5599_v44 }
 0x19c   :  { %v6291_v1 = vsub.f32 %v2960_v18, %v2988_v37 }
 0x19d   :  { %2432 = vmatmul.mubr.f32.vlgmr.msra.gmra.mrb[10].mxu1 %v5791_v30 }
 0x19e   :  { %4505 = vmatpush3.bf16.msra.mxu1 %v6595_v31  ;;  %2674 = vmatprep.mubr.f32.mxu1 %v6597_v41 }
 0x19f   :  { %4507 = vmatprep.subr.bf16.mxu1 %v6598_v9 }
 0x1a2   :  { %4509 = vmatpush3.bf16.msra.mxu1 %v6599_v57 }
 0x1a3   :  { %4511 = vmatprep.subr.bf16.mxu1 %v6600_v60 }
 0x1a6   :  { %4513 = vmatpush3.bf16.msra.mxu1 %v6601_v62 }
 0x1a7   :  { %4515 = vmatprep.subr.bf16.mxu1 %v6602_v38 }
 0x1aa   :  { %4517 = vmatpush3.bf16.msra.mxu1 %v6603_v63 }
 0x1ab   :  { %4519 = vmatprep.subr.bf16.mxu1 %v6604_v17 }
 0x1ae   :  { %4521 = vmatpush3.bf16.msra.mxu1 %v6605_v10 }
 0x1af   :  { %4523 = vmatprep.subr.bf16.mxu1 %v6606_v46 }
 0x1b2   :  { %4525 = vmatpush3.bf16.msra.mxu1 %v6607_v4 }
 0x1b3   :  { %4527 = vmatprep.subr.bf16.mxu1 %v6608_v11 }
 0x1b6   :  { %4529 = vmatpush3.bf16.msra.mxu1 %v6609_v45 }
 0x1b7   :  { %4531 = vmatprep.subr.bf16.mxu1 %v6610_v48 }
 0x1ba   :  { %4533 = vmatpush3.bf16.msra.mxu1 %v6611_v61 }
 0x1bb   :  { %4567 = vmatprep.subr.bf16.mxu1 %v5599_v44 }
 0x1bd   :  { %2678 = vmatmul.mubr.f32.vlgmr.msra.gmra.mrb[12].mxu1 %v6612_v19 }
 0x1be   :  { %4569 = vmatpush3.bf16.msra.mxu1 %v6595_v31  ;;  %2948 = vmatprep.mubr.f32.mxu1 %v5547_v14  ;;  %v2991_v31 = vand.u32 4294901760, %v2961_v21 }
 0x1bf   :  { %4571 = vmatprep.subr.bf16.mxu1 %v6598_v9 }
 0x1c0   :  { %v6293_v41 = vsub.f32 %v2961_v21, %v2991_v31 }
 0x1c2   :  { %4573 = vmatpush3.bf16.msra.mxu1 %v6599_v57  ;;  %v2962_v57 = vld [vmem:[%s6404_s5 + $0x30] sm:$0xff]  ;;  %v4629_v39 = vpack.c.bf16 %v6293_v41, %v6291_v1 }
 0x1c3   :  { %4575 = vmatprep.subr.bf16.mxu1 %v6600_v60  ;;  %v2963_v60 = vld [vmem:[%s6404_s5 + $0x38] sm:$0xff] }
 0x1c6   :  { %4577 = vmatpush3.bf16.msra.mxu1 %v6601_v62 }
 0x1c7   :  { %4579 = vmatprep.subr.bf16.mxu1 %v6602_v38  ;;  %v3089_v38 = vand.u32 4294901760, %v6291_v1 }
 0x1ca   :  { %4581 = vmatpush3.bf16.msra.mxu1 %v6603_v63  ;;  %v3096_v63 = vand.u32 4294901760, %v6293_v41 }
 0x1cb   :  { %4583 = vmatprep.subr.bf16.mxu1 %v6604_v17  ;;  %v2994_v17 = vand.u32 4294901760, %v2962_v57 }
 0x1cc   :  { %v4653_v40 = vpack.c.bf16 %v3096_v63, %v3089_v38 }
 0x1ce   :  { %4585 = vmatpush3.bf16.msra.mxu1 %v6605_v10  ;;  %v2997_v10 = vand.u32 4294901760, %v2963_v60 }
 0x1cf   :  { %4587 = vmatprep.subr.bf16.mxu1 %v6606_v46 }
 0x1d2   :  { %4589 = vmatpush3.bf16.msra.mxu1 %v6607_v4  ;;  %v3090_v4 = vsub.f32 %v6291_v1, %v3089_v38 }
 0x1d3   :  { %4591 = vmatprep.subr.bf16.mxu1 %v6608_v11  ;;  %v3097_v11 = vsub.f32 %v6293_v41, %v3096_v63 }
 0x1d5   :  { %v3098_v19 = vand.u32 4294901760, %v3097_v11 }
 0x1d6   :  { %4593 = vmatpush3.bf16.msra.mxu1 %v6609_v45  ;;  %v6305_v45 = vsub.f32 %v2962_v57, %v2994_v17 }
 0x1d7   :  { %4595 = vmatprep.subr.bf16.mxu1 %v6610_v48  ;;  %v6307_v48 = vsub.f32 %v2963_v60, %v2997_v10 }
 0x1da   :  { %4597 = vmatpush3.bf16.msra.mxu1 %v6611_v61  ;;  %v3091_v61 = vand.u32 4294901760, %v3090_v4 }
 0x1db   :  { %4598 = vmatprep.subr.bf16.mxu1 %v4733_v50 }
 0x1dd   :  { %2950 = vmatmul.mubr.f32.vlgmr.msra.gmra.mrb[14].mxu1 %v5791_v30  ;;  %v6230_v30 = vld [vmem:[%s6404_s5] sm:$0xff] }
 0x1de   :  { %v2976_v16 = vand.u32 4294901760, %v6230_v30 }
 0x1e0   :  { %v6254_v26 = vsub.f32 %v6230_v30, %v2976_v16  ;;  %v6321_v30 = vpack.c.bf16 %v2985_v54, %v2982_v34  ;;  %v4632_v34 = vpack.c.bf16 %v6307_v48, %v6305_v45 }
 0x1e2   :  { %v3061_v7 = vand.u32 4294901760, %v6254_v26  ;;  %v4623_v13 = vpack.c.bf16 %v6257_v36, %v6254_v26 }
 0x1e4   :  { %v3062_v53 = vsub.f32 %v6254_v26, %v3061_v7  ;;  %v4647_v32 = vpack.c.bf16 %v3068_v56, %v3061_v7 }
 0x1e6   :  { %v3063_v0 = vand.u32 4294901760, %v3062_v53 }
 0x1e8   :  { %v4611_v8 = vpack.c.bf16 %v3070_v25, %v3063_v0 }
 0x1ea   :  { %v3632_v14 = vpop.f32.mrb[2].mxu0  ;;  %4612 = vmatpush3.bf16.msra.mxu0 %v4611_v8 }
 0x1eb   :  { %v3633_v44 = vpop.f32.mrb[3].mxu0  ;;  %4613 = vmatprep.subr.bf16.mxu0 %v4733_v50 }
 0x1ec   :  { %v3634_v22 = vadd.f32 %v3633_v44, %v3632_v14  ;;  %v3103_v14 = vand.u32 4294901760, %v6305_v45  ;;  %v3110_v44 = vand.u32 4294901760, %v6307_v48 }
 0x1ee   :  { %4615 = vmatpush3.bf16.msra.mxu0 %v4614_v6  ;;  %v4656_v8 = vpack.c.bf16 %v3110_v44, %v3103_v14 }
 0x1ef   :  { %4616 = vmatprep.subr.bf16.mxu0 %v4733_v50 }
 0x1f0   :  { %v3562_v27 = vpop.f32.mrb[2].mxu1 }
 0x1f1   :  { %v3563_v49 = vpop.f32.mrb[3].mxu1 }
 0x1f2   :  { %v3564_v43 = vadd.f32 %v3563_v49, %v3562_v27  ;;  %v4617_v49 = vpack.c.bf16 %v3098_v19, %v3091_v61  ;;  %v4650_v61 = vpack.c.bf16 %v3082_v55, %v3075_v35  ;;  %v3529_v35 = vld [vmem:[%s6405_s6] ss:$0 sm:$0xff] }
 0x1f4   :  { %v1340_v28 = vadd.f32 %v3564_v43, %v3528_v20  ;;  %v3104_v43 = vsub.f32 %v6305_v45, %v3103_v14  ;;  %v6313_v20 = vpack.c.bf16 %v2979_v51, %v2976_v16  ;;  %4618 = vmatpush3.bf16.msra.mxu0 %v4617_v49  ;;  %v6613_v16 = vmov 0.0  }
 0x1f5   :  { %4619 = vmatprep.subr.bf16.mxu0 %v4733_v50  ;;  %4039 = vmatprep.mubr.msk.f32.mxu0 %vm4734_vm1, %v6613_v16  ;;  %v6338_v51 = vpack.c.bf16 %v2997_v10, %v2994_v17 }
 0x1f6   :  { %4600 = vmatpush3.bf16.msra.mxu1 %v6313_v20  ;;  %4020 = vmatprep.mubr.msk.f32.mxu1 %vm4734_vm1, %v6613_v16 }
 0x1f7   :  { %4601 = vmatprep.subr.bf16.mxu1 %v4733_v50 }
 0x1fa   :  { %4603 = vmatpush3.bf16.msra.mxu1 %v6321_v30 }
 0x1fb   :  { %4604 = vmatprep.subr.bf16.mxu1 %v4733_v50 }
 0x20a   :  { %v3702_v15 = vpop.f32.mrb[4].mxu0 }
 0x20b   :  { %v3703_v23 = vpop.f32.mrb[5].mxu0 }
 0x20c   :  { %v6222_v12 = vadd.f32 %v3703_v23, %v3702_v15  ;;  %v3111_v15 = vsub.f32 %v6307_v48, %v3110_v44 }
 0x210   :  { %v3597_v42 = vpop.f32.mrb[4].mxu1 }
 0x211   :  { %v3598_v59 = vpop.f32.mrb[5].mxu1 }
 0x212   :  { %v3599_v5 = vadd.f32 %v3598_v59, %v3597_v42  ;;  %v3105_v42 = vand.u32 4294901760, %v3104_v43  ;;  %v3112_v59 = vand.u32 4294901760, %v3111_v15 }
 0x214   :  { %v1572_v33 = vadd.f32 %v3599_v5, %v1340_v28  ;;  %v4620_v5 = vpack.c.bf16 %v3112_v59, %v3105_v42 }
 0x216   :  { %v1710_v47 = vadd.f32 %v3634_v22, %v1572_v33  ;;  %4621 = vmatpush3.bf16.msra.mxu0 %v4620_v5 }
 0x217   :  { %4622 = vmatprep.subr.bf16.mxu0 %v4733_v50 }
 0x22a   :  { %v3772_v9 = vpop.f32.mrb[6].mxu0 }
 0x22b   :  { %v3773_v62 = vpop.f32.mrb[7].mxu0 }
 0x22c   :  { %v3774_v46 = vadd.f32 %v3773_v62, %v3772_v9 }
 0x230   :  { %v3667_v22 = vpop.f32.mrb[6].mxu1 }
 0x231   :  { %v3668_v27 = vpop.f32.mrb[7].mxu1 }
 0x232   :  { %v3669_v23 = vadd.f32 %v3668_v27, %v3667_v22 }
 0x234   :  { %v1818_v28 = vadd.f32 %v3669_v23, %v1710_v47 }
 0x236   :  { %v1986_v33 = vadd.f32 %v6222_v12, %v1818_v28  ;;  %v6332_v12 = vpack.c.bf16 %v2991_v31, %v2988_v37 }
 0x238   :  { %4606 = vmatpush3.bf16.msra.mxu1 %v6332_v12 }
 0x239   :  { %4607 = vmatprep.subr.bf16.mxu1 %v4733_v50 }
 0x23c   :  { %4609 = vmatpush3.bf16.msra.mxu1 %v6338_v51 }
 0x24a   :  { %v3842_v47 = vpop.f32.mrb[8].mxu0 }
 0x24b   :  { %v3843_v54 = vpop.f32.mrb[9].mxu0 }
 0x24c   :  { %v3844_v53 = vadd.f32 %v3843_v54, %v3842_v47 }
 0x250   :  { %v3737_v52 = vpop.f32.mrb[8].mxu1 }
 0x251   :  { %v3738_v29 = vpop.f32.mrb[9].mxu1 }
 0x252   :  { %v3739_v3 = vadd.f32 %v3738_v29, %v3737_v52 }
 0x254   :  { %v2090_v0 = vadd.f32 %v3739_v3, %v1986_v33 }
 0x256   :  { %v2202_v25 = vadd.f32 %v3774_v46, %v2090_v0 }
 0x26a   :  { %v3912_v6 = vpop.f32.mrb[10].mxu0 }
 0x26b   :  { %v3913_v18 = vpop.f32.mrb[11].mxu0 }
 0x26c   :  { %v3914_v21 = vadd.f32 %v3913_v18, %v3912_v6 }
 0x270   :  { %v3807_v37 = vpop.f32.mrb[10].mxu1 }
 0x271   :  { %v3808_v31 = vpop.f32.mrb[11].mxu1 }
 0x272   :  { %v3809_v1 = vadd.f32 %v3808_v31, %v3807_v37 }
 0x274   :  { %v2434_v41 = vadd.f32 %v3809_v1, %v2202_v25 }
 0x276   :  { %v2572_v9 = vadd.f32 %v3844_v53, %v2434_v41 }
 0x290   :  { %v3877_v57 = vpop.f32.mrb[12].mxu1 }
 0x291   :  { %v3878_v60 = vpop.f32.mrb[13].mxu1 }
 0x292   :  { %v3879_v62 = vadd.f32 %v3878_v60, %v3877_v57 }
 0x294   :  { %v2680_v17 = vadd.f32 %v3879_v62, %v2572_v9 }
 0x296   :  { %v2848_v10 = vadd.f32 %v3914_v21, %v2680_v17 }
 0x2b0   :  { %v3947_v46 = vpop.f32.mrb[14].mxu1 }
 0x2b1   :  { %v3948_v26 = vpop.f32.mrb[15].mxu1 }
 0x2b2   :  { %v3949_v4 = vadd.f32 %v3948_v26, %v3947_v46 }
 0x2b4   :  { %v2952_v36 = vadd.f32 %v3949_v4, %v2848_v10 }
 0x2b6   :  { %v2955_v7 = vmax.f32 %v2952_v36, 0.0 }
 0x2b8   :  { %v2973_v56 = vsel %vm2971_vm2, %v2955_v7, 0 }
 0x2b9   :  { %v3048_v38 = vand.u32 4294901760, %v2973_v56 }
 0x2bb   :  { %v3049_v63 = vsub.f32 %v2973_v56, %v3048_v38  ;;  %4040 = vmatmul.mubr.f32.vlgmr.msra.gmra.mrb[12].mxu0 %v3048_v38 }
 0x2bc   :  { %4624 = vmatpush3.bf16.msra.mxu0 %v4623_v13  ;;  %4058 = vmatprep.mubr.msk.f32.mxu0 %vm4734_vm1, %v6613_v16 }
 0x2bd   :  { %4625 = vmatprep.subr.bf16.mxu0 %v4733_v50  ;;  %v3050_v11 = vand.u32 4294901760, %v3049_v63 }
 0x2bf   :  { %v3051_v45 = vsub.f32 %v3049_v63, %v3050_v11 }
 0x2c0   :  { %4627 = vmatpush3.bf16.msra.mxu0 %v4626_v2 }
 0x2c1   :  { %4628 = vmatprep.subr.bf16.mxu0 %v4733_v50  ;;  %v3052_v48 = vand.u32 4294901760, %v3051_v45 }
 0x2c3   :  { %4021 = vmatmul.mubr.f32.vlgmr.msra.gmra.mrb[16].mxu1 %v3052_v48 }
 0x2c4   :  { %4630 = vmatpush3.bf16.msra.mxu0 %v4629_v39 }
 0x2c5   :  { %4631 = vmatprep.subr.bf16.mxu0 %v4733_v50 }
 0x2c8   :  { %4633 = vmatpush3.bf16.msra.mxu0 %v4632_v34 }
 0x2c9   :  { %4634 = vmatprep.subr.bf16.mxu0 %v4733_v50 }
 0x2cb   :  { %4059 = vmatmul.mubr.f32.vlgmr.msra.gmra.mrb[12].mxu0 %v3049_v63 }
 0x2cc   :  { %4636 = vmatpush3.bf16.msra.mxu0 %v6313_v20  ;;  %4077 = vmatprep.mubr.msk.f32.mxu0 %vm4734_vm1, %v6613_v16 }
 0x2cd   :  { %4637 = vmatprep.subr.bf16.mxu0 %v4733_v50 }
 0x2d0   :  { %4639 = vmatpush3.bf16.msra.mxu0 %v6321_v30 }
 0x2d1   :  { %4640 = vmatprep.subr.bf16.mxu0 %v4733_v50 }
 0x2d4   :  { %4642 = vmatpush3.bf16.msra.mxu0 %v6332_v12 }
 0x2d5   :  { %4643 = vmatprep.subr.bf16.mxu0 %v4733_v50 }
 0x2d8   :  { %4645 = vmatpush3.bf16.msra.mxu0 %v6338_v51 }
 0x2d9   :  { %4646 = vmatprep.subr.bf16.mxu0 %v4733_v50 }
 0x2db   :  { %4078 = vmatmul.mubr.f32.vlgmr.msra.gmra.mrb[12].mxu0 %v3050_v11 }
 0x2dc   :  { %4648 = vmatpush3.bf16.msra.mxu0 %v4647_v32  ;;  %4096 = vmatprep.mubr.msk.f32.mxu0 %vm4734_vm1, %v6613_v16 }
 0x2dd   :  { %4649 = vmatprep.subr.bf16.mxu0 %v4733_v50 }
 0x2e0   :  { %4651 = vmatpush3.bf16.msra.mxu0 %v4650_v61 }
 0x2e1   :  { %4652 = vmatprep.subr.bf16.mxu0 %v4733_v50 }
 0x2e4   :  { %4654 = vmatpush3.bf16.msra.mxu0 %v4653_v40 }
 0x2e5   :  { %4655 = vmatprep.subr.bf16.mxu0 %v4733_v50 }
 0x2e8   :  { %4657 = vmatpush3.bf16.msra.mxu0 %v4656_v8 }
 0x2e9   :  { %4658 = vmatprep.subr.bf16.mxu0 %v4733_v50 }
 0x2eb   :  { %4097 = vmatmul.mubr.f32.vlgmr.msra.gmra.mrb[12].mxu0 %v3048_v38 }
 0x2ec   :  { %4660 = vmatpush3.bf16.msra.mxu0 %v6313_v20  ;;  %4115 = vmatprep.mubr.msk.f32.mxu0 %vm4734_vm1, %v6613_v16 }
 0x2ed   :  { %4661 = vmatprep.subr.bf16.mxu0 %v4733_v50 }
 0x2f0   :  { %4663 = vmatpush3.bf16.msra.mxu0 %v6321_v30 }
 0x2f1   :  { %4664 = vmatprep.subr.bf16.mxu0 %v4733_v50 }
 0x2f4   :  { %4666 = vmatpush3.bf16.msra.mxu0 %v6332_v12 }
 0x2f5   :  { %4667 = vmatprep.subr.bf16.mxu0 %v4733_v50 }
 0x2f8   :  { %4669 = vmatpush3.bf16.msra.mxu0 %v6338_v51 }
 0x2fb   :  { %4116 = vmatmul.mubr.f32.vlgmr.msra.gmra.mrb[12].mxu0 %v3048_v38 }
 0x396   :  { %v3054_v24 = vpop.f32.mrb[16].mxu1 }
 0x397   :  { %v4022_v58 = vpop.f32.mrb[17].mxu1  ;;  %v3055_v55 = vadd.f32 %v3529_v35, %v3054_v24 }
 0x3ce   :  { %v3508_v19 = vpop.f32.mrb[12].mxu0 }
 0x3cf   :  { %v4675_v14 = vadd.f32 %v3508_v19, %v3055_v55  ;;  %v4117_v44 = vpop.f32.mrb[13].mxu0 }
 0x3d1   :  { %3513 = vst.msk [vmem:[#allocation2] sm:$0xff] %vm3512_vm3, %v4675_v14 }
 0x3d2   :  { %4719 = shalt.err (!%p4716_p4)
}
 0x3d3   :  { %s4720_s6 = scalar_lea.hbm %s6406_s7, 128 }
 0x3d4   :  { %p4721_p5 = scmp.ne.s32.totalorder %s6406_s7, %s4720_s6  ;;  %p4724_p6 = scmp.lt.u32.totalorder %s4720_s6, %s6406_s7 }
 0x3d6   :  { %p4726_p7 = pnand %p4724_p6, %p4721_p5 }
 0x3d8   :  { %4729 = shalt.err (!%p4726_p7)
}
 0x3d9   :  { %3523 = dma.vmem_to_hbm [thread:$0]  %s3521_s28, 128, %s6406_s7, [#allocation3]  }
 0x3da   :  { %4730 = dma.done.wait [#allocation3], 128  }
 0x3db   :  { %4731 = vsyncadd [#allocation3], 4294967168 }
 0x3dc   :  { %3527 = vsyncpa [#allocation3], 1 }

</bundles_post_ra>
